<compile_context>
chip_gen: v6e
topology: v6e:2x2x1
jax: 0.10.0
libtpu: 0.0.40
codegen_flags: <defaults>
</compile_context>

<pallas_src>
import functools
import numpy as np
import jax
import jax.numpy as jnp
from jax.experimental import pallas as pl
from jax.experimental.pallas import tpu as pltpu

# --- small synthetic config ---
BATCH = 2
SEQ_DEC = 8
SEQ_ENC = 12
HIDDEN = 32
NUM_HEADS = 4
HEAD_DIM = 8          # NUM_HEADS * HEAD_DIM == HIDDEN (required by reference .view)
FF_DIM = 64
LN_EPS = 1e-12


# ---------------------------------------------------------------------------
# Helpers shared by the kernel body (traced inside Pallas) and the JAX reference
# ---------------------------------------------------------------------------
def _gelu(x):
    c = np.sqrt(2.0 / np.pi).astype(np.float32)
    return 0.5 * x * (1.0 + jnp.tanh(c * (x + 0.044715 * x * x * x)))


def _layernorm(x, gamma, beta, eps):
    mean = jnp.mean(x, axis=-1, keepdims=True)
    var = jnp.mean((x - mean) ** 2, axis=-1, keepdims=True)  # biased, like torch
    return (x - mean) / jnp.sqrt(var + eps) * gamma + beta


# ---------------------------------------------------------------------------
# Pallas kernel: full decoder layer, whole batch in one invocation (no grid)
# ---------------------------------------------------------------------------
def decoder_layer_kernel(
    x_ref, w_wide_ref, w_tall_ref, vec_ref,        # inputs
    out_ref,                                        # packed lane-dense output slab
    ctx_scr,                                        # VMEM scratch (B, S_dec, H)
    *, batch, s_dec, s_enc, hidden, num_heads, head_dim, eps,
):
    B, H, nh, hd = batch, hidden, num_heads, head_dim
    nd, ne = B * s_dec, B * s_enc
    ff_dim = w_wide_ref.shape[1] - 6 * H

    # make every output lane deterministic (payload only uses lanes [0:112))
    out_ref[...] = jnp.zeros_like(out_ref)

    X = x_ref[...]                      # (B*s_dec + B*s_enc, H) packed activations
    xd = X[0:nd, :]                     # flattened decoder tokens (proj input + residual)
    xe = X[nd:nd + ne, :]               # flattened encoder tokens
    Ww = w_wide_ref[...]                # (H, 4H | 2H | FF)  lane-packed weights
    Wt = w_tall_ref[...]                # (H | H | FF, H)    sublane-packed weights
    V = vec_ref[...]                    # (8, 128)           lane-packed biases / LN params

    # ---- fused input projections: 2 lane-dense MXU calls instead of 6 narrow ones ----
    # proj_d lanes: [0:H)=Q_self  [H:2H)=K_self  [2H:3H)=V_self  [3H:4H)=Q_cross
    proj_d = jnp.dot(xd, Ww[:, 0:4 * H],
                     preferred_element_type=jnp.float32) + V[0:1, 0:4 * H]
    # proj_e lanes: [0:H)=K_cross  [H:2H)=V_cross
    proj_e = jnp.dot(xe, Ww[:, 4 * H:6 * H],
                     preferred_element_type=jnp.float32) + V[1:2, 0:2 * H]
    proj_d3 = proj_d.reshape(B, s_dec, 4 * H)
    proj_e3 = proj_e.reshape(B, s_enc, 2 * H)

    scale = 1.0 / float(hd) ** 0.5

    def attention(kv3, k_off, v_off, q_off, s_kv, w_o, b_o, prob_lane0):
        # Per-head, batch-parallel attention.  Probabilities are stored straight into
        # the packed output slab (static lane slices, no lane concat); per-head contexts
        # go into static lane slices of the shared VMEM scratch, so the output
        # projection is one (B*s_q, H) x (H, H) MXU call.
        for h in range(nh):                       # static head loop, batched over B
            qh = proj_d3[:, :, q_off + h * hd:q_off + (h + 1) * hd]
            kh = kv3[:, :, k_off + h * hd:k_off + (h + 1) * hd]
            vh = kv3[:, :, v_off + h * hd:v_off + (h + 1) * hd]
            s = jnp.einsum('bqd,bkd->bqk', qh, kh,
                           preferred_element_type=jnp.float32) * scale
            # NOTE: reference masked_fill is not in-place -> masks intentionally unused.
            s = s - jnp.max(s, axis=-1, keepdims=True)
            e = jnp.exp(s)
            p = e * pl.reciprocal(jnp.sum(e, axis=-1, keepdims=True), approx=False)
            out_ref[:, :, prob_lane0 + h * s_kv:prob_lane0 + (h + 1) * s_kv] = p
            ctx_scr[:, :, h * hd:(h + 1) * hd] = jnp.einsum(
                'bqk,bkd->bqd', p, vh, preferred_element_type=jnp.float32)
        ctx = ctx_scr[...].reshape(nd, H)         # heads already lane-merged in scratch
        return jnp.dot(ctx, w_o, preferred_element_type=jnp.float32) + b_o

    # unpack biases / LN params (static slices of the single (8,128) vec slab)
    bo1, bo2 = V[1:2, 2 * H:3 * H], V[1:2, 3 * H:4 * H]
    bf1, bf2 = V[2:3, 0:ff_dim], V[2:3, ff_dim:ff_dim + H]
    g1, be1 = V[3:4, 0:H], V[3:4, H:2 * H]
    g2, be2 = V[3:4, 2 * H:3 * H], V[3:4, 3 * H:4 * H]
    g3, be3 = V[4:5, 0:H], V[4:5, H:2 * H]

    # ---- self-attention + residual + LN1 ----
    a1 = attention(proj_d3, H, 2 * H, 0, s_dec, Wt[0:H, :], bo1, H)
    h1 = _layernorm(a1 + xd, g1, be1, eps)

    # ---- cross-attention (query = ORIGINAL dec inputs, per reference) + LN2 ----
    a2 = attention(proj_e3, 0, H, 3 * H, s_enc, Wt[H:2 * H, :], bo2, H + nh * s_dec)
    h2 = _layernorm(a2 + h1, g2, be2, eps)

    # ---- feed-forward + residual + LN3 ----
    ff = jnp.dot(h2, Ww[:, 6 * H:], preferred_element_type=jnp.float32) + bf1
    ff = _gelu(ff)
    ff = jnp.dot(ff, Wt[2 * H:, :], preferred_element_type=jnp.float32) + bf2
    out = _layernorm(ff + h2, g3, be3, eps)
    out_ref[:, :, 0:H] = out.reshape(B, s_dec, H)


def decoder_layer_pallas(dec_inputs, enc_outputs, self_mask, cross_mask, kernel_params):
    """dec_inputs (B,Sd,H), enc_outputs (B,Se,H) -> (out, self_probs, cross_probs)."""
    # Masks accepted for signature fidelity; the reference's masked_fill is not
    # in-place, so they have no effect on the output.
    del self_mask, cross_mask
    B, S_dec, H = dec_inputs.shape
    S_enc = enc_outputs.shape[1]
    w_wide, w_tall, vec = kernel_params

    # packed lane-dense output slab: [0:H)=out, then self probs, then cross probs
    payload = H + NUM_HEADS * (S_dec + S_enc)
    out_lanes = ((payload + 127) // 128) * 128

    # hoist flattening / packing to XLA (free HBM layout plumbing): one activation DMA
    x_all = jnp.concatenate(
        [dec_inputs.reshape(B * S_dec, H), enc_outputs.reshape(B * S_enc, H)], axis=0)

    kern = functools.partial(
        decoder_layer_kernel, batch=B, s_dec=S_dec, s_enc=S_enc, hidden=H,
        num_heads=NUM_HEADS, head_dim=HEAD_DIM, eps=LN_EPS)

    slab = pl.pallas_call(
        kern,
        out_shape=jax.ShapeDtypeStruct((B, S_dec, out_lanes), jnp.float32),
        scratch_shapes=[pltpu.VMEM((B, S_dec, H), jnp.float32)],
    )(x_all, w_wide, w_tall, vec)

    # free layout plumbing back to the PyTorch (B, nh, S_q, S_kv) layout
    out = slab[:, :, 0:H]
    sp = slab[:, :, H:H + NUM_HEADS * S_dec]
    cp = slab[:, :, H + NUM_HEADS * S_dec:payload]
    self_probs = sp.reshape(B, S_dec, NUM_HEADS, S_dec).transpose(0, 2, 1, 3)
    cross_probs = cp.reshape(B, S_dec, NUM_HEADS, S_enc).transpose(0, 2, 1, 3)
    return out, self_probs, cross_probs


# ---------------------------------------------------------------------------
# Parameter construction (unpacked, Linear-style) + packing into kernel slabs
# ---------------------------------------------------------------------------
def init_params(key):
    ks = jax.random.split(key, 26)
    H, F = HIDDEN, FF_DIM

    def w(k, shape, scale=0.05):
        return (scale * jax.random.normal(k, shape)).astype(jnp.float32)

    def b(k, n, scale=0.02, shift=0.0):
        return (shift + scale * jax.random.normal(k, (n,))).astype(jnp.float32)

    return {
        'wq1': w(ks[0], (H, H)), 'wk1': w(ks[1], (H, H)),
        'wv1': w(ks[2], (H, H)), 'wo1': w(ks[3], (H, H)),
        'wq2': w(ks[4], (H, H)), 'wk2': w(ks[5], (H, H)),
        'wv2': w(ks[6], (H, H)), 'wo2': w(ks[7], (H, H)),
        'wf1': w(ks[8], (H, F)), 'wf2': w(ks[9], (F, H)),
        'bq1': b(ks[10], H), 'bk1': b(ks[11], H), 'bv1': b(ks[12], H), 'bo1': b(ks[13], H),
        'bq2': b(ks[14], H), 'bk2': b(ks[15], H), 'bv2': b(ks[16], H), 'bo2': b(ks[17], H),
        'bf1': b(ks[18], F), 'bf2': b(ks[19], H),
        'g1': b(ks[20], H, shift=1.0), 'be1': b(ks[21], H),
        'g2': b(ks[22], H, shift=1.0), 'be2': b(ks[23], H),
        'g3': b(ks[24], H, shift=1.0), 'be3': b(ks[25], H),
    }


def pack_params(p):
    """Pack all parameters into 3 DMA-friendly slabs for the kernel."""
    # lane-packed "wide" slab: everything consumed with H contraction rows
    w_wide = jnp.concatenate(
        [p['wq1'], p['wk1'], p['wv1'], p['wq2'], p['wk2'], p['wv2'], p['wf1']], axis=1)
    # sublane-packed "tall" slab: everything producing H output lanes
    w_tall = jnp.concatenate([p['wo1'], p['wo2'], p['wf2']], axis=0)

    def row(*parts):
        v = jnp.concatenate(parts)
        return jnp.pad(v, (0, 128 - v.shape[0]))

    vec = jnp.stack([
        row(p['bq1'], p['bk1'], p['bv1'], p['bq2']),     # bias for fused xd projection
        row(p['bk2'], p['bv2'], p['bo1'], p['bo2']),     # bias for fused xe proj + Wo's
        row(p['bf1'], p['bf2']),
        row(p['g1'], p['be1'], p['g2'], p['be2']),
        row(p['g3'], p['be3']),
        jnp.zeros((128,), jnp.float32),
        jnp.zeros((128,), jnp.float32),
        jnp.zeros((128,), jnp.float32),
    ], axis=0)                                           # (8, 128): one vreg tile
    return w_wide, w_tall, vec


# ---------------------------------------------------------------------------
# Pure-JAX reference (mirrors the PyTorch module) for a sanity check
# ---------------------------------------------------------------------------
def _ref_mha(q_in, kv_in, wq, bq, wk, bk, wv, bv, wo, bo):
    B, Sq, H = q_in.shape
    Skv = kv_in.shape[1]
    q = (q_in @ wq + bq).reshape(B, Sq, NUM_HEADS, HEAD_DIM).transpose(0, 2, 1, 3)
    k = (kv_in @ wk + bk).reshape(B, Skv, NUM_HEADS, HEAD_DIM).transpose(0, 2, 1, 3)
    v = (kv_in @ wv + bv).reshape(B, Skv, NUM_HEADS, HEAD_DIM).transpose(0, 2, 1, 3)
    s = jnp.einsum('bhqd,bhkd->bhqk', q, k) / (HEAD_DIM ** 0.5)
    p = jax.nn.softmax(s, axis=-1)
    ctx = jnp.einsum('bhqk,bhkd->bhqd', p, v).transpose(0, 2, 1, 3).reshape(B, Sq, H)
    return ctx @ wo + bo, p


def _ref_decoder_layer(dec, enc, p):
    a1, p1 = _ref_mha(dec, dec, p['wq1'], p['bq1'], p['wk1'], p['bk1'],
                      p['wv1'], p['bv1'], p['wo1'], p['bo1'])
    h1 = _layernorm(a1 + dec, p['g1'], p['be1'], LN_EPS)
    a2, p2 = _ref_mha(dec, enc, p['wq2'], p['bq2'], p['wk2'], p['bk2'],
                      p['wv2'], p['bv2'], p['wo2'], p['bo2'])
    h2 = _layernorm(a2 + h1, p['g2'], p['be2'], LN_EPS)
    ff = _gelu(h2 @ p['wf1'] + p['bf1']) @ p['wf2'] + p['bf2']
    out = _layernorm(ff + h2, p['g3'], p['be3'], LN_EPS)
    return out, p1, p2


if __name__ == "__main__":
    key = jax.random.PRNGKey(0)
    pkey, dkey, ekey, mkey1, mkey2 = jax.random.split(key, 5)
    params = init_params(pkey)
    kernel_params = pack_params(params)

    dec = jax.random.normal(dkey, (BATCH, SEQ_DEC, HIDDEN), dtype=jnp.float32)
    enc = jax.random.normal(ekey, (BATCH, SEQ_ENC, HIDDEN), dtype=jnp.float32)
    self_mask = jax.random.bernoulli(mkey1, 0.2, (BATCH, SEQ_DEC, SEQ_DEC))
    cross_mask = jax.random.bernoulli(mkey2, 0.2, (BATCH, SEQ_DEC, SEQ_ENC))

    out, sp, cp = decoder_layer_pallas(dec, enc, self_mask, cross_mask, kernel_params)
    out = jax.block_until_ready(out)
    sp = jax.block_until_ready(sp)
    cp = jax.block_until_ready(cp)

    out_r, sp_r, cp_r = _ref_decoder_layer(dec, enc, params)
    err_sp = float(jnp.max(jnp.abs(sp - sp_r)))
    err_cp = float(jnp.max(jnp.abs(cp - cp_r)))
    err_out = float(jnp.max(jnp.abs(out - out_r)))
    assert err_sp < 1e-5, f"self-attn prob mismatch: {err_sp}"
    assert err_cp < 1e-5, f"cross-attn prob mismatch: {err_cp}"
    assert err_out < 1e-4, f"output mismatch: {err_out}"

    print("KERNEL_OK")
</pallas_src>

<mosaic_0001>
module attributes {stable_mosaic.version = 11 : i64} {
  func.func @decoder_layer_kernel(%arg0: memref<40x32xf32, #tpu.memory_space<vmem>>, %arg1: memref<32x256xf32, #tpu.memory_space<vmem>>, %arg2: memref<128x32xf32, #tpu.memory_space<vmem>>, %arg3: memref<8x128xf32, #tpu.memory_space<vmem>>, %arg4: memref<2x8x128xf32, #tpu.memory_space<vmem>>, %arg5: memref<2x8x32xf32, #tpu.memory_space<vmem>>) attributes {dimension_semantics = [], scalar_prefetch = 0 : i64, scratch_operands = 1 : i64, tpu.core_type = #tpu.core_type<tc>} {
    %cst = arith.constant 0.000000e+00 : f32
    %0 = vector.broadcast %cst : f32 to vector<2x8x128xf32>
    %c0 = arith.constant 0 : index
    %c0_0 = arith.constant 0 : index
    %c0_1 = arith.constant 0 : index
    %1 = vector.load %arg4[%c0, %c0_0, %c0_1] : memref<2x8x128xf32, #tpu.memory_space<vmem>>, vector<2x8x128xf32>
    tpu.vector_store %arg4[%c0, %c0_0, %c0_1], %0 {strides = array<i32>} : memref<2x8x128xf32, #tpu.memory_space<vmem>>, vector<2x8x128xf32>,
    %c0_2 = arith.constant 0 : index
    %c0_3 = arith.constant 0 : index
    %2 = vector.load %arg0[%c0_2, %c0_3] : memref<40x32xf32, #tpu.memory_space<vmem>>, vector<40x32xf32>
    %3 = vector.extract_strided_slice %2 {offsets = [0, 0], sizes = [16, 32], strides = [1, 1]} : vector<40x32xf32> to vector<16x32xf32>
    %4 = vector.extract_strided_slice %2 {offsets = [16, 0], sizes = [24, 32], strides = [1, 1]} : vector<40x32xf32> to vector<24x32xf32>
    %c0_4 = arith.constant 0 : index
    %c0_5 = arith.constant 0 : index
    %5 = vector.load %arg1[%c0_4, %c0_5] : memref<32x256xf32, #tpu.memory_space<vmem>>, vector<32x256xf32>
    %c0_6 = arith.constant 0 : index
    %c0_7 = arith.constant 0 : index
    %6 = vector.load %arg2[%c0_6, %c0_7] : memref<128x32xf32, #tpu.memory_space<vmem>>, vector<128x32xf32>
    %c0_8 = arith.constant 0 : index
    %c0_9 = arith.constant 0 : index
    %7 = vector.load %arg3[%c0_8, %c0_9] : memref<8x128xf32, #tpu.memory_space<vmem>>, vector<8x128xf32>
    %8 = vector.extract_strided_slice %5 {offsets = [0, 0], sizes = [32, 128], strides = [1, 1]} : vector<32x256xf32> to vector<32x128xf32>
    %cst_10 = arith.constant dense<0.000000e+00> : vector<16x128xf32>
    %9 = tpu.matmul %3, %8, %cst_10 {dimension_numbers = #tpu.dot_dimension_numbers<[1], [0], [0], [1], [0, 0, 1, 1], [], []>} : vector<16x32xf32>, vector<32x128xf32>, vector<16x128xf32> -> vector<16x128xf32>
    %10 = vector.extract_strided_slice %7 {offsets = [0, 0], sizes = [1, 128], strides = [1, 1]} : vector<8x128xf32> to vector<1x128xf32>
    %11 = vector.broadcast %10 : vector<1x128xf32> to vector<16x128xf32>
    %12 = arith.addf %9, %11 : vector<16x128xf32>
    %13 = vector.extract_strided_slice %5 {offsets = [0, 128], sizes = [32, 64], strides = [1, 1]} : vector<32x256xf32> to vector<32x64xf32>
    %cst_11 = arith.constant dense<0.000000e+00> : vector<24x64xf32>
    %14 = tpu.matmul %4, %13, %cst_11 {dimension_numbers = #tpu.dot_dimension_numbers<[1], [0], [0], [1], [0, 0, 1, 1], [], []>} : vector<24x32xf32>, vector<32x64xf32>, vector<24x64xf32> -> vector<24x64xf32>
    %15 = vector.extract_strided_slice %7 {offsets = [1, 0], sizes = [1, 64], strides = [1, 1]} : vector<8x128xf32> to vector<1x64xf32>
    %16 = vector.broadcast %15 : vector<1x64xf32> to vector<24x64xf32>
    %17 = arith.addf %14, %16 : vector<24x64xf32>
    %18 = vector.shape_cast %12 : vector<16x128xf32> to vector<2x8x128xf32>
    %19 = vector.shape_cast %17 : vector<24x64xf32> to vector<2x12x64xf32>
    %20 = vector.extract_strided_slice %7 {offsets = [1, 64], sizes = [1, 32], strides = [1, 1]} : vector<8x128xf32> to vector<1x32xf32>
    %21 = vector.extract_strided_slice %7 {offsets = [1, 96], sizes = [1, 32], strides = [1, 1]} : vector<8x128xf32> to vector<1x32xf32>
    %22 = vector.extract_strided_slice %7 {offsets = [2, 0], sizes = [1, 64], strides = [1, 1]} : vector<8x128xf32> to vector<1x64xf32>
    %23 = vector.extract_strided_slice %7 {offsets = [2, 64], sizes = [1, 32], strides = [1, 1]} : vector<8x128xf32> to vector<1x32xf32>
    %24 = vector.extract_strided_slice %7 {offsets = [3, 0], sizes = [1, 32], strides = [1, 1]} : vector<8x128xf32> to vector<1x32xf32>
    %25 = vector.extract_strided_slice %7 {offsets = [3, 32], sizes = [1, 32], strides = [1, 1]} : vector<8x128xf32> to vector<1x32xf32>
    %26 = vector.extract_strided_slice %7 {offsets = [3, 64], sizes = [1, 32], strides = [1, 1]} : vector<8x128xf32> to vector<1x32xf32>
    %27 = vector.extract_strided_slice %7 {offsets = [3, 96], sizes = [1, 32], strides = [1, 1]} : vector<8x128xf32> to vector<1x32xf32>
    %28 = vector.extract_strided_slice %7 {offsets = [4, 0], sizes = [1, 32], strides = [1, 1]} : vector<8x128xf32> to vector<1x32xf32>
    %29 = vector.extract_strided_slice %7 {offsets = [4, 32], sizes = [1, 32], strides = [1, 1]} : vector<8x128xf32> to vector<1x32xf32>
    %30 = vector.extract_strided_slice %6 {offsets = [0, 0], sizes = [32, 32], strides = [1, 1]} : vector<128x32xf32> to vector<32x32xf32>
    %31 = vector.extract_strided_slice %18 {offsets = [0, 0, 0], sizes = [2, 8, 8], strides = [1, 1, 1]} : vector<2x8x128xf32> to vector<2x8x8xf32>
    %32 = vector.extract_strided_slice %18 {offsets = [0, 0, 32], sizes = [2, 8, 8], strides = [1, 1, 1]} : vector<2x8x128xf32> to vector<2x8x8xf32>
    %33 = vector.extract_strided_slice %18 {offsets = [0, 0, 64], sizes = [2, 8, 8], strides = [1, 1, 1]} : vector<2x8x128xf32> to vector<2x8x8xf32>
    "tpu.trace_start"() <{level = 10 : i32, message = "bqd,bkd->bqk"}> : () -> ()
    %cst_12 = arith.constant dense<0.000000e+00> : vector<2x8x8xf32>
    %34 = tpu.matmul %31, %32, %cst_12 {dimension_numbers = #tpu.dot_dimension_numbers<[2], [2], [1], [1], [0, 0, 0, 1, 1, 1], [0], [0]>} : vector<2x8x8xf32>, vector<2x8x8xf32>, vector<2x8x8xf32> -> vector<2x8x8xf32>
    "tpu.trace_stop"() : () -> ()
    %cst_13 = arith.constant 0.353553385 : f32
    %35 = vector.broadcast %cst_13 : f32 to vector<2x8x8xf32>
    %36 = arith.mulf %34, %35 : vector<2x8x8xf32>
    %cst_14 = arith.constant dense<0xFF800000> : vector<2x8xf32>
    %37 = vector.multi_reduction <maximumf>, %36, %cst_14 [2] : vector<2x8x8xf32> to vector<2x8xf32>
    %38 = vector.shape_cast %37 : vector<2x8xf32> to vector<2x8x1xf32>
    %39 = vector.broadcast %38 : vector<2x8x1xf32> to vector<2x8x8xf32>
    %40 = arith.subf %36, %39 : vector<2x8x8xf32>
    %41 = math.exp %40 : vector<2x8x8xf32>
    %cst_15 = arith.constant dense<0.000000e+00> : vector<2x8xf32>
    %42 = vector.multi_reduction <add>, %41, %cst_15 [2] : vector<2x8x8xf32> to vector<2x8xf32>
    %43 = vector.shape_cast %42 : vector<2x8xf32> to vector<2x8x1xf32>
    %44 = tpu.reciprocal %43 : vector<2x8x1xf32> -> vector<2x8x1xf32>
    %45 = vector.broadcast %44 : vector<2x8x1xf32> to vector<2x8x8xf32>
    %46 = arith.mulf %41, %45 : vector<2x8x8xf32>
    %c0_16 = arith.constant 0 : index
    %c0_17 = arith.constant 0 : index
    %c32 = arith.constant 32 : index
    %47 = vector.load %arg4[%c0_16, %c0_17, %c32] : memref<2x8x128xf32, #tpu.memory_space<vmem>>, vector<2x8x8xf32>
    tpu.vector_store %arg4[%c0_16, %c0_17, %c32], %46 {strides = array<i32>} : memref<2x8x128xf32, #tpu.memory_space<vmem>>, vector<2x8x8xf32>,
    "tpu.trace_start"() <{level = 10 : i32, message = "bqk,bkd->bqd"}> : () -> ()
    %cst_18 = arith.constant dense<0.000000e+00> : vector<2x8x8xf32>
    %48 = tpu.matmul %46, %33, %cst_18 {dimension_numbers = #tpu.dot_dimension_numbers<[2], [1], [1], [2], [0, 0, 0, 1, 1, 2], [0], [0]>} : vector<2x8x8xf32>, vector<2x8x8xf32>, vector<2x8x8xf32> -> vector<2x8x8xf32>
    "tpu.trace_stop"() : () -> ()
    %c0_19 = arith.constant 0 : index
    %c0_20 = arith.constant 0 : index
    %c0_21 = arith.constant 0 : index
    %49 = vector.load %arg5[%c0_19, %c0_20, %c0_21] : memref<2x8x32xf32, #tpu.memory_space<vmem>>, vector<2x8x8xf32>
    tpu.vector_store %arg5[%c0_19, %c0_20, %c0_21], %48 {strides = array<i32>} : memref<2x8x32xf32, #tpu.memory_space<vmem>>, vector<2x8x8xf32>,
    %50 = vector.extract_strided_slice %18 {offsets = [0, 0, 8], sizes = [2, 8, 8], strides = [1, 1, 1]} : vector<2x8x128xf32> to vector<2x8x8xf32>
    %51 = vector.extract_strided_slice %18 {offsets = [0, 0, 40], sizes = [2, 8, 8], strides = [1, 1, 1]} : vector<2x8x128xf32> to vector<2x8x8xf32>
    %52 = vector.extract_strided_slice %18 {offsets = [0, 0, 72], sizes = [2, 8, 8], strides = [1, 1, 1]} : vector<2x8x128xf32> to vector<2x8x8xf32>
    "tpu.trace_start"() <{level = 10 : i32, message = "bqd,bkd->bqk"}> : () -> ()
    %cst_22 = arith.constant dense<0.000000e+00> : vector<2x8x8xf32>
    %53 = tpu.matmul %50, %51, %cst_22 {dimension_numbers = #tpu.dot_dimension_numbers<[2], [2], [1], [1], [0, 0, 0, 1, 1, 1], [0], [0]>} : vector<2x8x8xf32>, vector<2x8x8xf32>, vector<2x8x8xf32> -> vector<2x8x8xf32>
    "tpu.trace_stop"() : () -> ()
    %cst_23 = arith.constant 0.353553385 : f32
    %54 = vector.broadcast %cst_23 : f32 to vector<2x8x8xf32>
    %55 = arith.mulf %53, %54 : vector<2x8x8xf32>
    %cst_24 = arith.constant dense<0xFF800000> : vector<2x8xf32>
    %56 = vector.multi_reduction <maximumf>, %55, %cst_24 [2] : vector<2x8x8xf32> to vector<2x8xf32>
    %57 = vector.shape_cast %56 : vector<2x8xf32> to vector<2x8x1xf32>
    %58 = vector.broadcast %57 : vector<2x8x1xf32> to vector<2x8x8xf32>
    %59 = arith.subf %55, %58 : vector<2x8x8xf32>
    %60 = math.exp %59 : vector<2x8x8xf32>
    %cst_25 = arith.constant dense<0.000000e+00> : vector<2x8xf32>
    %61 = vector.multi_reduction <add>, %60, %cst_25 [2] : vector<2x8x8xf32> to vector<2x8xf32>
    %62 = vector.shape_cast %61 : vector<2x8xf32> to vector<2x8x1xf32>
    %63 = tpu.reciprocal %62 : vector<2x8x1xf32> -> vector<2x8x1xf32>
    %64 = vector.broadcast %63 : vector<2x8x1xf32> to vector<2x8x8xf32>
    %65 = arith.mulf %60, %64 : vector<2x8x8xf32>
    %c0_26 = arith.constant 0 : index
    %c0_27 = arith.constant 0 : index
    %c40 = arith.constant 40 : index
    %66 = vector.load %arg4[%c0_26, %c0_27, %c40] : memref<2x8x128xf32, #tpu.memory_space<vmem>>, vector<2x8x8xf32>
    tpu.vector_store %arg4[%c0_26, %c0_27, %c40], %65 {strides = array<i32>} : memref<2x8x128xf32, #tpu.memory_space<vmem>>, vector<2x8x8xf32>,
    "tpu.trace_start"() <{level = 10 : i32, message = "bqk,bkd->bqd"}> : () -> ()
    %cst_28 = arith.constant dense<0.000000e+00> : vector<2x8x8xf32>
    %67 = tpu.matmul %65, %52, %cst_28 {dimension_numbers = #tpu.dot_dimension_numbers<[2], [1], [1], [2], [0, 0, 0, 1, 1, 2], [0], [0]>} : vector<2x8x8xf32>, vector<2x8x8xf32>, vector<2x8x8xf32> -> vector<2x8x8xf32>
    "tpu.trace_stop"() : () -> ()
    %c0_29 = arith.constant 0 : index
    %c0_30 = arith.constant 0 : index
    %c8 = arith.constant 8 : index
    %68 = vector.load %arg5[%c0_29, %c0_30, %c8] : memref<2x8x32xf32, #tpu.memory_space<vmem>>, vector<2x8x8xf32>
    tpu.vector_store %arg5[%c0_29, %c0_30, %c8], %67 {strides = array<i32>} : memref<2x8x32xf32, #tpu.memory_space<vmem>>, vector<2x8x8xf32>,
    %69 = vector.extract_strided_slice %18 {offsets = [0, 0, 16], sizes = [2, 8, 8], strides = [1, 1, 1]} : vector<2x8x128xf32> to vector<2x8x8xf32>
    %70 = vector.extract_strided_slice %18 {offsets = [0, 0, 48], sizes = [2, 8, 8], strides = [1, 1, 1]} : vector<2x8x128xf32> to vector<2x8x8xf32>
    %71 = vector.extract_strided_slice %18 {offsets = [0, 0, 80], sizes = [2, 8, 8], strides = [1, 1, 1]} : vector<2x8x128xf32> to vector<2x8x8xf32>
    "tpu.trace_start"() <{level = 10 : i32, message = "bqd,bkd->bqk"}> : () -> ()
    %cst_31 = arith.constant dense<0.000000e+00> : vector<2x8x8xf32>
    %72 = tpu.matmul %69, %70, %cst_31 {dimension_numbers = #tpu.dot_dimension_numbers<[2], [2], [1], [1], [0, 0, 0, 1, 1, 1], [0], [0]>} : vector<2x8x8xf32>, vector<2x8x8xf32>, vector<2x8x8xf32> -> vector<2x8x8xf32>
    "tpu.trace_stop"() : () -> ()
    %cst_32 = arith.constant 0.353553385 : f32
    %73 = vector.broadcast %cst_32 : f32 to vector<2x8x8xf32>
    %74 = arith.mulf %72, %73 : vector<2x8x8xf32>
    %cst_33 = arith.constant dense<0xFF800000> : vector<2x8xf32>
    %75 = vector.multi_reduction <maximumf>, %74, %cst_33 [2] : vector<2x8x8xf32> to vector<2x8xf32>
    %76 = vector.shape_cast %75 : vector<2x8xf32> to vector<2x8x1xf32>
    %77 = vector.broadcast %76 : vector<2x8x1xf32> to vector<2x8x8xf32>
    %78 = arith.subf %74, %77 : vector<2x8x8xf32>
    %79 = math.exp %78 : vector<2x8x8xf32>
    %cst_34 = arith.constant dense<0.000000e+00> : vector<2x8xf32>
    %80 = vector.multi_reduction <add>, %79, %cst_34 [2] : vector<2x8x8xf32> to vector<2x8xf32>
    %81 = vector.shape_cast %80 : vector<2x8xf32> to vector<2x8x1xf32>
    %82 = tpu.reciprocal %81 : vector<2x8x1xf32> -> vector<2x8x1xf32>
    %83 = vector.broadcast %82 : vector<2x8x1xf32> to vector<2x8x8xf32>
    %84 = arith.mulf %79, %83 : vector<2x8x8xf32>
    %c0_35 = arith.constant 0 : index
    %c0_36 = arith.constant 0 : index
    %c48 = arith.constant 48 : index
    %85 = vector.load %arg4[%c0_35, %c0_36, %c48] : memref<2x8x128xf32, #tpu.memory_space<vmem>>, vector<2x8x8xf32>
    tpu.vector_store %arg4[%c0_35, %c0_36, %c48], %84 {strides = array<i32>} : memref<2x8x128xf32, #tpu.memory_space<vmem>>, vector<2x8x8xf32>,
    "tpu.trace_start"() <{level = 10 : i32, message = "bqk,bkd->bqd"}> : () -> ()
    %cst_37 = arith.constant dense<0.000000e+00> : vector<2x8x8xf32>
    %86 = tpu.matmul %84, %71, %cst_37 {dimension_numbers = #tpu.dot_dimension_numbers<[2], [1], [1], [2], [0, 0, 0, 1, 1, 2], [0], [0]>} : vector<2x8x8xf32>, vector<2x8x8xf32>, vector<2x8x8xf32> -> vector<2x8x8xf32>
    "tpu.trace_stop"() : () -> ()
    %c0_38 = arith.constant 0 : index
    %c0_39 = arith.constant 0 : index
    %c16 = arith.constant 16 : index
    %87 = vector.load %arg5[%c0_38, %c0_39, %c16] : memref<2x8x32xf32, #tpu.memory_space<vmem>>, vector<2x8x8xf32>
    tpu.vector_store %arg5[%c0_38, %c0_39, %c16], %86 {strides = array<i32>} : memref<2x8x32xf32, #tpu.memory_space<vmem>>, vector<2x8x8xf32>,
    %88 = vector.extract_strided_slice %18 {offsets = [0, 0, 24], sizes = [2, 8, 8], strides = [1, 1, 1]} : vector<2x8x128xf32> to vector<2x8x8xf32>
    %89 = vector.extract_strided_slice %18 {offsets = [0, 0, 56], sizes = [2, 8, 8], strides = [1, 1, 1]} : vector<2x8x128xf32> to vector<2x8x8xf32>
    %90 = vector.extract_strided_slice %18 {offsets = [0, 0, 88], sizes = [2, 8, 8], strides = [1, 1, 1]} : vector<2x8x128xf32> to vector<2x8x8xf32>
    "tpu.trace_start"() <{level = 10 : i32, message = "bqd,bkd->bqk"}> : () -> ()
    %cst_40 = arith.constant dense<0.000000e+00> : vector<2x8x8xf32>
    %91 = tpu.matmul %88, %89, %cst_40 {dimension_numbers = #tpu.dot_dimension_numbers<[2], [2], [1], [1], [0, 0, 0, 1, 1, 1], [0], [0]>} : vector<2x8x8xf32>, vector<2x8x8xf32>, vector<2x8x8xf32> -> vector<2x8x8xf32>
    "tpu.trace_stop"() : () -> ()
    %cst_41 = arith.constant 0.353553385 : f32
    %92 = vector.broadcast %cst_41 : f32 to vector<2x8x8xf32>
    %93 = arith.mulf %91, %92 : vector<2x8x8xf32>
    %cst_42 = arith.constant dense<0xFF800000> : vector<2x8xf32>
    %94 = vector.multi_reduction <maximumf>, %93, %cst_42 [2] : vector<2x8x8xf32> to vector<2x8xf32>
    %95 = vector.shape_cast %94 : vector<2x8xf32> to vector<2x8x1xf32>
    %96 = vector.broadcast %95 : vector<2x8x1xf32> to vector<2x8x8xf32>
    %97 = arith.subf %93, %96 : vector<2x8x8xf32>
    %98 = math.exp %97 : vector<2x8x8xf32>
    %cst_43 = arith.constant dense<0.000000e+00> : vector<2x8xf32>
    %99 = vector.multi_reduction <add>, %98, %cst_43 [2] : vector<2x8x8xf32> to vector<2x8xf32>
    %100 = vector.shape_cast %99 : vector<2x8xf32> to vector<2x8x1xf32>
    %101 = tpu.reciprocal %100 : vector<2x8x1xf32> -> vector<2x8x1xf32>
    %102 = vector.broadcast %101 : vector<2x8x1xf32> to vector<2x8x8xf32>
    %103 = arith.mulf %98, %102 : vector<2x8x8xf32>
    %c0_44 = arith.constant 0 : index
    %c0_45 = arith.constant 0 : index
    %c56 = arith.constant 56 : index
    %104 = vector.load %arg4[%c0_44, %c0_45, %c56] : memref<2x8x128xf32, #tpu.memory_space<vmem>>, vector<2x8x8xf32>
    tpu.vector_store %arg4[%c0_44, %c0_45, %c56], %103 {strides = array<i32>} : memref<2x8x128xf32, #tpu.memory_space<vmem>>, vector<2x8x8xf32>,
    "tpu.trace_start"() <{level = 10 : i32, message = "bqk,bkd->bqd"}> : () -> ()
    %cst_46 = arith.constant dense<0.000000e+00> : vector<2x8x8xf32>
    %105 = tpu.matmul %103, %90, %cst_46 {dimension_numbers = #tpu.dot_dimension_numbers<[2], [1], [1], [2], [0, 0, 0, 1, 1, 2], [0], [0]>} : vector<2x8x8xf32>, vector<2x8x8xf32>, vector<2x8x8xf32> -> vector<2x8x8xf32>
    "tpu.trace_stop"() : () -> ()
    %c0_47 = arith.constant 0 : index
    %c0_48 = arith.constant 0 : index
    %c24 = arith.constant 24 : index
    %106 = vector.load %arg5[%c0_47, %c0_48, %c24] : memref<2x8x32xf32, #tpu.memory_space<vmem>>, vector<2x8x8xf32>
    tpu.vector_store %arg5[%c0_47, %c0_48, %c24], %105 {strides = array<i32>} : memref<2x8x32xf32, #tpu.memory_space<vmem>>, vector<2x8x8xf32>,
    %c0_49 = arith.constant 0 : index
    %c0_50 = arith.constant 0 : index
    %c0_51 = arith.constant 0 : index
    %107 = vector.load %arg5[%c0_49, %c0_50, %c0_51] : memref<2x8x32xf32, #tpu.memory_space<vmem>>, vector<2x8x32xf32>
    %108 = vector.shape_cast %107 : vector<2x8x32xf32> to vector<16x32xf32>
    %cst_52 = arith.constant dense<0.000000e+00> : vector<16x32xf32>
    %109 = tpu.matmul %108, %30, %cst_52 {dimension_numbers = #tpu.dot_dimension_numbers<[1], [0], [0], [1], [0, 0, 1, 1], [], []>} : vector<16x32xf32>, vector<32x32xf32>, vector<16x32xf32> -> vector<16x32xf32>
    %110 = vector.broadcast %20 : vector<1x32xf32> to vector<16x32xf32>
    %111 = arith.addf %109, %110 : vector<16x32xf32>
    %112 = arith.addf %111, %3 : vector<16x32xf32>
    %cst_53 = arith.constant dense<0.000000e+00> : vector<16xf32>
    %113 = vector.multi_reduction <add>, %112, %cst_53 [1] : vector<16x32xf32> to vector<16xf32>
    %114 = vector.shape_cast %113 : vector<16xf32> to vector<16x1xf32>
    %cst_54 = arith.constant 3.200000e+01 : f32
    %115 = vector.broadcast %cst_54 : f32 to vector<16x1xf32>
    %116 = arith.divf %114, %115 : vector<16x1xf32>
    %117 = vector.broadcast %116 : vector<16x1xf32> to vector<16x32xf32>
    %118 = arith.subf %112, %117 : vector<16x32xf32>
    %119 = arith.mulf %118, %118 : vector<16x32xf32>
    %cst_55 = arith.constant dense<0.000000e+00> : vector<16xf32>
    %120 = vector.multi_reduction <add>, %119, %cst_55 [1] : vector<16x32xf32> to vector<16xf32>
    %121 = vector.shape_cast %120 : vector<16xf32> to vector<16x1xf32>
    %cst_56 = arith.constant 3.200000e+01 : f32
    %122 = vector.broadcast %cst_56 : f32 to vector<16x1xf32>
    %123 = arith.divf %121, %122 : vector<16x1xf32>
    %124 = vector.broadcast %116 : vector<16x1xf32> to vector<16x32xf32>
    %125 = arith.subf %112, %124 : vector<16x32xf32>
    %cst_57 = arith.constant 9.99999996E-13 : f32
    %126 = vector.broadcast %cst_57 : f32 to vector<16x1xf32>
    %127 = arith.addf %123, %126 : vector<16x1xf32>
    %128 = math.sqrt %127 : vector<16x1xf32>
    %129 = vector.broadcast %128 : vector<16x1xf32> to vector<16x32xf32>
    %130 = arith.divf %125, %129 : vector<16x32xf32>
    %131 = vector.broadcast %24 : vector<1x32xf32> to vector<16x32xf32>
    %132 = arith.mulf %130, %131 : vector<16x32xf32>
    %133 = vector.broadcast %25 : vector<1x32xf32> to vector<16x32xf32>
    %134 = arith.addf %132, %133 : vector<16x32xf32>
    %135 = vector.extract_strided_slice %6 {offsets = [32, 0], sizes = [32, 32], strides = [1, 1]} : vector<128x32xf32> to vector<32x32xf32>
    %136 = vector.extract_strided_slice %18 {offsets = [0, 0, 96], sizes = [2, 8, 8], strides = [1, 1, 1]} : vector<2x8x128xf32> to vector<2x8x8xf32>
    %137 = vector.extract_strided_slice %19 {offsets = [0, 0, 0], sizes = [2, 12, 8], strides = [1, 1, 1]} : vector<2x12x64xf32> to vector<2x12x8xf32>
    %138 = vector.extract_strided_slice %19 {offsets = [0, 0, 32], sizes = [2, 12, 8], strides = [1, 1, 1]} : vector<2x12x64xf32> to vector<2x12x8xf32>
    "tpu.trace_start"() <{level = 10 : i32, message = "bqd,bkd->bqk"}> : () -> ()
    %cst_58 = arith.constant dense<0.000000e+00> : vector<2x8x12xf32>
    %139 = tpu.matmul %136, %137, %cst_58 {dimension_numbers = #tpu.dot_dimension_numbers<[2], [2], [1], [1], [0, 0, 0, 1, 1, 1], [0], [0]>} : vector<2x8x8xf32>, vector<2x12x8xf32>, vector<2x8x12xf32> -> vector<2x8x12xf32>
    "tpu.trace_stop"() : () -> ()
    %cst_59 = arith.constant 0.353553385 : f32
    %140 = vector.broadcast %cst_59 : f32 to vector<2x8x12xf32>
    %141 = arith.mulf %139, %140 : vector<2x8x12xf32>
    %cst_60 = arith.constant dense<0xFF800000> : vector<2x8xf32>
    %142 = vector.multi_reduction <maximumf>, %141, %cst_60 [2] : vector<2x8x12xf32> to vector<2x8xf32>
    %143 = vector.shape_cast %142 : vector<2x8xf32> to vector<2x8x1xf32>
    %144 = vector.broadcast %143 : vector<2x8x1xf32> to vector<2x8x12xf32>
    %145 = arith.subf %141, %144 : vector<2x8x12xf32>
    %146 = math.exp %145 : vector<2x8x12xf32>
    %cst_61 = arith.constant dense<0.000000e+00> : vector<2x8xf32>
    %147 = vector.multi_reduction <add>, %146, %cst_61 [2] : vector<2x8x12xf32> to vector<2x8xf32>
    %148 = vector.shape_cast %147 : vector<2x8xf32> to vector<2x8x1xf32>
    %149 = tpu.reciprocal %148 : vector<2x8x1xf32> -> vector<2x8x1xf32>
    %150 = vector.broadcast %149 : vector<2x8x1xf32> to vector<2x8x12xf32>
    %151 = arith.mulf %146, %150 : vector<2x8x12xf32>
    %c0_62 = arith.constant 0 : index
    %c0_63 = arith.constant 0 : index
    %c64 = arith.constant 64 : index
    %152 = vector.load %arg4[%c0_62, %c0_63, %c64] : memref<2x8x128xf32, #tpu.memory_space<vmem>>, vector<2x8x12xf32>
    tpu.vector_store %arg4[%c0_62, %c0_63, %c64], %151 {strides = array<i32>} : memref<2x8x128xf32, #tpu.memory_space<vmem>>, vector<2x8x12xf32>,
    "tpu.trace_start"() <{level = 10 : i32, message = "bqk,bkd->bqd"}> : () -> ()
    %cst_64 = arith.constant dense<0.000000e+00> : vector<2x8x8xf32>
    %153 = tpu.matmul %151, %138, %cst_64 {dimension_numbers = #tpu.dot_dimension_numbers<[2], [1], [1], [2], [0, 0, 0, 1, 1, 2], [0], [0]>} : vector<2x8x12xf32>, vector<2x12x8xf32>, vector<2x8x8xf32> -> vector<2x8x8xf32>
    "tpu.trace_stop"() : () -> ()
    %c0_65 = arith.constant 0 : index
    %c0_66 = arith.constant 0 : index
    %c0_67 = arith.constant 0 : index
    %154 = vector.load %arg5[%c0_65, %c0_66, %c0_67] : memref<2x8x32xf32, #tpu.memory_space<vmem>>, vector<2x8x8xf32>
    tpu.vector_store %arg5[%c0_65, %c0_66, %c0_67], %153 {strides = array<i32>} : memref<2x8x32xf32, #tpu.memory_space<vmem>>, vector<2x8x8xf32>,
    %155 = vector.extract_strided_slice %18 {offsets = [0, 0, 104], sizes = [2, 8, 8], strides = [1, 1, 1]} : vector<2x8x128xf32> to vector<2x8x8xf32>
    %156 = vector.extract_strided_slice %19 {offsets = [0, 0, 8], sizes = [2, 12, 8], strides = [1, 1, 1]} : vector<2x12x64xf32> to vector<2x12x8xf32>
    %157 = vector.extract_strided_slice %19 {offsets = [0, 0, 40], sizes = [2, 12, 8], strides = [1, 1, 1]} : vector<2x12x64xf32> to vector<2x12x8xf32>
    "tpu.trace_start"() <{level = 10 : i32, message = "bqd,bkd->bqk"}> : () -> ()
    %cst_68 = arith.constant dense<0.000000e+00> : vector<2x8x12xf32>
    %158 = tpu.matmul %155, %156, %cst_68 {dimension_numbers = #tpu.dot_dimension_numbers<[2], [2], [1], [1], [0, 0, 0, 1, 1, 1], [0], [0]>} : vector<2x8x8xf32>, vector<2x12x8xf32>, vector<2x8x12xf32> -> vector<2x8x12xf32>
    "tpu.trace_stop"() : () -> ()
    %cst_69 = arith.constant 0.353553385 : f32
    %159 = vector.broadcast %cst_69 : f32 to vector<2x8x12xf32>
    %160 = arith.mulf %158, %159 : vector<2x8x12xf32>
    %cst_70 = arith.constant dense<0xFF800000> : vector<2x8xf32>
    %161 = vector.multi_reduction <maximumf>, %160, %cst_70 [2] : vector<2x8x12xf32> to vector<2x8xf32>
    %162 = vector.shape_cast %161 : vector<2x8xf32> to vector<2x8x1xf32>
    %163 = vector.broadcast %162 : vector<2x8x1xf32> to vector<2x8x12xf32>
    %164 = arith.subf %160, %163 : vector<2x8x12xf32>
    %165 = math.exp %164 : vector<2x8x12xf32>
    %cst_71 = arith.constant dense<0.000000e+00> : vector<2x8xf32>
    %166 = vector.multi_reduction <add>, %165, %cst_71 [2] : vector<2x8x12xf32> to vector<2x8xf32>
    %167 = vector.shape_cast %166 : vector<2x8xf32> to vector<2x8x1xf32>
    %168 = tpu.reciprocal %167 : vector<2x8x1xf32> -> vector<2x8x1xf32>
    %169 = vector.broadcast %168 : vector<2x8x1xf32> to vector<2x8x12xf32>
    %170 = arith.mulf %165, %169 : vector<2x8x12xf32>
    %c0_72 = arith.constant 0 : index
    %c0_73 = arith.constant 0 : index
    %c76 = arith.constant 76 : index
    %171 = vector.load %arg4[%c0_72, %c0_73, %c76] : memref<2x8x128xf32, #tpu.memory_space<vmem>>, vector<2x8x12xf32>
    tpu.vector_store %arg4[%c0_72, %c0_73, %c76], %170 {strides = array<i32>} : memref<2x8x128xf32, #tpu.memory_space<vmem>>, vector<2x8x12xf32>,
    "tpu.trace_start"() <{level = 10 : i32, message = "bqk,bkd->bqd"}> : () -> ()
    %cst_74 = arith.constant dense<0.000000e+00> : vector<2x8x8xf32>
    %172 = tpu.matmul %170, %157, %cst_74 {dimension_numbers = #tpu.dot_dimension_numbers<[2], [1], [1], [2], [0, 0, 0, 1, 1, 2], [0], [0]>} : vector<2x8x12xf32>, vector<2x12x8xf32>, vector<2x8x8xf32> -> vector<2x8x8xf32>
    "tpu.trace_stop"() : () -> ()
    %c0_75 = arith.constant 0 : index
    %c0_76 = arith.constant 0 : index
    %c8_77 = arith.constant 8 : index
    %173 = vector.load %arg5[%c0_75, %c0_76, %c8_77] : memref<2x8x32xf32, #tpu.memory_space<vmem>>, vector<2x8x8xf32>
    tpu.vector_store %arg5[%c0_75, %c0_76, %c8_77], %172 {strides = array<i32>} : memref<2x8x32xf32, #tpu.memory_space<vmem>>, vector<2x8x8xf32>,
    %174 = vector.extract_strided_slice %18 {offsets = [0, 0, 112], sizes = [2, 8, 8], strides = [1, 1, 1]} : vector<2x8x128xf32> to vector<2x8x8xf32>
    %175 = vector.extract_strided_slice %19 {offsets = [0, 0, 16], sizes = [2, 12, 8], strides = [1, 1, 1]} : vector<2x12x64xf32> to vector<2x12x8xf32>
    %176 = vector.extract_strided_slice %19 {offsets = [0, 0, 48], sizes = [2, 12, 8], strides = [1, 1, 1]} : vector<2x12x64xf32> to vector<2x12x8xf32>
    "tpu.trace_start"() <{level = 10 : i32, message = "bqd,bkd->bqk"}> : () -> ()
    %cst_78 = arith.constant dense<0.000000e+00> : vector<2x8x12xf32>
    %177 = tpu.matmul %174, %175, %cst_78 {dimension_numbers = #tpu.dot_dimension_numbers<[2], [2], [1], [1], [0, 0, 0, 1, 1, 1], [0], [0]>} : vector<2x8x8xf32>, vector<2x12x8xf32>, vector<2x8x12xf32> -> vector<2x8x12xf32>
    "tpu.trace_stop"() : () -> ()
    %cst_79 = arith.constant 0.353553385 : f32
    %178 = vector.broadcast %cst_79 : f32 to vector<2x8x12xf32>
    %179 = arith.mulf %177, %178 : vector<2x8x12xf32>
    %cst_80 = arith.constant dense<0xFF800000> : vector<2x8xf32>
    %180 = vector.multi_reduction <maximumf>, %179, %cst_80 [2] : vector<2x8x12xf32> to vector<2x8xf32>
    %181 = vector.shape_cast %180 : vector<2x8xf32> to vector<2x8x1xf32>
    %182 = vector.broadcast %181 : vector<2x8x1xf32> to vector<2x8x12xf32>
    %183 = arith.subf %179, %182 : vector<2x8x12xf32>
    %184 = math.exp %183 : vector<2x8x12xf32>
    %cst_81 = arith.constant dense<0.000000e+00> : vector<2x8xf32>
    %185 = vector.multi_reduction <add>, %184, %cst_81 [2] : vector<2x8x12xf32> to vector<2x8xf32>
    %186 = vector.shape_cast %185 : vector<2x8xf32> to vector<2x8x1xf32>
    %187 = tpu.reciprocal %186 : vector<2x8x1xf32> -> vector<2x8x1xf32>
    %188 = vector.broadcast %187 : vector<2x8x1xf32> to vector<2x8x12xf32>
    %189 = arith.mulf %184, %188 : vector<2x8x12xf32>
    %c0_82 = arith.constant 0 : index
    %c0_83 = arith.constant 0 : index
    %c88 = arith.constant 88 : index
    %190 = vector.load %arg4[%c0_82, %c0_83, %c88] : memref<2x8x128xf32, #tpu.memory_space<vmem>>, vector<2x8x12xf32>
    tpu.vector_store %arg4[%c0_82, %c0_83, %c88], %189 {strides = array<i32>} : memref<2x8x128xf32, #tpu.memory_space<vmem>>, vector<2x8x12xf32>,
    "tpu.trace_start"() <{level = 10 : i32, message = "bqk,bkd->bqd"}> : () -> ()
    %cst_84 = arith.constant dense<0.000000e+00> : vector<2x8x8xf32>
    %191 = tpu.matmul %189, %176, %cst_84 {dimension_numbers = #tpu.dot_dimension_numbers<[2], [1], [1], [2], [0, 0, 0, 1, 1, 2], [0], [0]>} : vector<2x8x12xf32>, vector<2x12x8xf32>, vector<2x8x8xf32> -> vector<2x8x8xf32>
    "tpu.trace_stop"() : () -> ()
    %c0_85 = arith.constant 0 : index
    %c0_86 = arith.constant 0 : index
    %c16_87 = arith.constant 16 : index
    %192 = vector.load %arg5[%c0_85, %c0_86, %c16_87] : memref<2x8x32xf32, #tpu.memory_space<vmem>>, vector<2x8x8xf32>
    tpu.vector_store %arg5[%c0_85, %c0_86, %c16_87], %191 {strides = array<i32>} : memref<2x8x32xf32, #tpu.memory_space<vmem>>, vector<2x8x8xf32>,
    %193 = vector.extract_strided_slice %18 {offsets = [0, 0, 120], sizes = [2, 8, 8], strides = [1, 1, 1]} : vector<2x8x128xf32> to vector<2x8x8xf32>
    %194 = vector.extract_strided_slice %19 {offsets = [0, 0, 24], sizes = [2, 12, 8], strides = [1, 1, 1]} : vector<2x12x64xf32> to vector<2x12x8xf32>
    %195 = vector.extract_strided_slice %19 {offsets = [0, 0, 56], sizes = [2, 12, 8], strides = [1, 1, 1]} : vector<2x12x64xf32> to vector<2x12x8xf32>
    "tpu.trace_start"() <{level = 10 : i32, message = "bqd,bkd->bqk"}> : () -> ()
    %cst_88 = arith.constant dense<0.000000e+00> : vector<2x8x12xf32>
    %196 = tpu.matmul %193, %194, %cst_88 {dimension_numbers = #tpu.dot_dimension_numbers<[2], [2], [1], [1], [0, 0, 0, 1, 1, 1], [0], [0]>} : vector<2x8x8xf32>, vector<2x12x8xf32>, vector<2x8x12xf32> -> vector<2x8x12xf32>
    "tpu.trace_stop"() : () -> ()
    %cst_89 = arith.constant 0.353553385 : f32
    %197 = vector.broadcast %cst_89 : f32 to vector<2x8x12xf32>
    %198 = arith.mulf %196, %197 : vector<2x8x12xf32>
    %cst_90 = arith.constant dense<0xFF800000> : vector<2x8xf32>
    %199 = vector.multi_reduction <maximumf>, %198, %cst_90 [2] : vector<2x8x12xf32> to vector<2x8xf32>
    %200 = vector.shape_cast %199 : vector<2x8xf32> to vector<2x8x1xf32>
    %201 = vector.broadcast %200 : vector<2x8x1xf32> to vector<2x8x12xf32>
    %202 = arith.subf %198, %201 : vector<2x8x12xf32>
    %203 = math.exp %202 : vector<2x8x12xf32>
    %cst_91 = arith.constant dense<0.000000e+00> : vector<2x8xf32>
    %204 = vector.multi_reduction <add>, %203, %cst_91 [2] : vector<2x8x12xf32> to vector<2x8xf32>
    %205 = vector.shape_cast %204 : vector<2x8xf32> to vector<2x8x1xf32>
    %206 = tpu.reciprocal %205 : vector<2x8x1xf32> -> vector<2x8x1xf32>
    %207 = vector.broadcast %206 : vector<2x8x1xf32> to vector<2x8x12xf32>
    %208 = arith.mulf %203, %207 : vector<2x8x12xf32>
    %c0_92 = arith.constant 0 : index
    %c0_93 = arith.constant 0 : index
    %c100 = arith.constant 100 : index
    %209 = vector.load %arg4[%c0_92, %c0_93, %c100] : memref<2x8x128xf32, #tpu.memory_space<vmem>>, vector<2x8x12xf32>
    tpu.vector_store %arg4[%c0_92, %c0_93, %c100], %208 {strides = array<i32>} : memref<2x8x128xf32, #tpu.memory_space<vmem>>, vector<2x8x12xf32>,
    "tpu.trace_start"() <{level = 10 : i32, message = "bqk,bkd->bqd"}> : () -> ()
    %cst_94 = arith.constant dense<0.000000e+00> : vector<2x8x8xf32>
    %210 = tpu.matmul %208, %195, %cst_94 {dimension_numbers = #tpu.dot_dimension_numbers<[2], [1], [1], [2], [0, 0, 0, 1, 1, 2], [0], [0]>} : vector<2x8x12xf32>, vector<2x12x8xf32>, vector<2x8x8xf32> -> vector<2x8x8xf32>
    "tpu.trace_stop"() : () -> ()
    %c0_95 = arith.constant 0 : index
    %c0_96 = arith.constant 0 : index
    %c24_97 = arith.constant 24 : index
    %211 = vector.load %arg5[%c0_95, %c0_96, %c24_97] : memref<2x8x32xf32, #tpu.memory_space<vmem>>, vector<2x8x8xf32>
    tpu.vector_store %arg5[%c0_95, %c0_96, %c24_97], %210 {strides = array<i32>} : memref<2x8x32xf32, #tpu.memory_space<vmem>>, vector<2x8x8xf32>,
    %c0_98 = arith.constant 0 : index
    %c0_99 = arith.constant 0 : index
    %c0_100 = arith.constant 0 : index
    %212 = vector.load %arg5[%c0_98, %c0_99, %c0_100] : memref<2x8x32xf32, #tpu.memory_space<vmem>>, vector<2x8x32xf32>
    %213 = vector.shape_cast %212 : vector<2x8x32xf32> to vector<16x32xf32>
    %cst_101 = arith.constant dense<0.000000e+00> : vector<16x32xf32>
    %214 = tpu.matmul %213, %135, %cst_101 {dimension_numbers = #tpu.dot_dimension_numbers<[1], [0], [0], [1], [0, 0, 1, 1], [], []>} : vector<16x32xf32>, vector<32x32xf32>, vector<16x32xf32> -> vector<16x32xf32>
    %215 = vector.broadcast %21 : vector<1x32xf32> to vector<16x32xf32>
    %216 = arith.addf %214, %215 : vector<16x32xf32>
    %217 = arith.addf %216, %134 : vector<16x32xf32>
    %cst_102 = arith.constant dense<0.000000e+00> : vector<16xf32>
    %218 = vector.multi_reduction <add>, %217, %cst_102 [1] : vector<16x32xf32> to vector<16xf32>
    %219 = vector.shape_cast %218 : vector<16xf32> to vector<16x1xf32>
    %cst_103 = arith.constant 3.200000e+01 : f32
    %220 = vector.broadcast %cst_103 : f32 to vector<16x1xf32>
    %221 = arith.divf %219, %220 : vector<16x1xf32>
    %222 = vector.broadcast %221 : vector<16x1xf32> to vector<16x32xf32>
    %223 = arith.subf %217, %222 : vector<16x32xf32>
    %224 = arith.mulf %223, %223 : vector<16x32xf32>
    %cst_104 = arith.constant dense<0.000000e+00> : vector<16xf32>
    %225 = vector.multi_reduction <add>, %224, %cst_104 [1] : vector<16x32xf32> to vector<16xf32>
    %226 = vector.shape_cast %225 : vector<16xf32> to vector<16x1xf32>
    %cst_105 = arith.constant 3.200000e+01 : f32
    %227 = vector.broadcast %cst_105 : f32 to vector<16x1xf32>
    %228 = arith.divf %226, %227 : vector<16x1xf32>
    %229 = vector.broadcast %221 : vector<16x1xf32> to vector<16x32xf32>
    %230 = arith.subf %217, %229 : vector<16x32xf32>
    %cst_106 = arith.constant 9.99999996E-13 : f32
    %231 = vector.broadcast %cst_106 : f32 to vector<16x1xf32>
    %232 = arith.addf %228, %231 : vector<16x1xf32>
    %233 = math.sqrt %232 : vector<16x1xf32>
    %234 = vector.broadcast %233 : vector<16x1xf32> to vector<16x32xf32>
    %235 = arith.divf %230, %234 : vector<16x32xf32>
    %236 = vector.broadcast %26 : vector<1x32xf32> to vector<16x32xf32>
    %237 = arith.mulf %235, %236 : vector<16x32xf32>
    %238 = vector.broadcast %27 : vector<1x32xf32> to vector<16x32xf32>
    %239 = arith.addf %237, %238 : vector<16x32xf32>
    %240 = vector.extract_strided_slice %5 {offsets = [0, 192], sizes = [32, 64], strides = [1, 1]} : vector<32x256xf32> to vector<32x64xf32>
    %cst_107 = arith.constant dense<0.000000e+00> : vector<16x64xf32>
    %241 = tpu.matmul %239, %240, %cst_107 {dimension_numbers = #tpu.dot_dimension_numbers<[1], [0], [0], [1], [0, 0, 1, 1], [], []>} : vector<16x32xf32>, vector<32x64xf32>, vector<16x64xf32> -> vector<16x64xf32>
    %242 = vector.broadcast %22 : vector<1x64xf32> to vector<16x64xf32>
    %243 = arith.addf %241, %242 : vector<16x64xf32>
    %cst_108 = arith.constant 5.000000e-01 : f32
    %244 = vector.broadcast %cst_108 : f32 to vector<16x64xf32>
    %245 = arith.mulf %244, %243 : vector<16x64xf32>
    %cst_109 = arith.constant 4.471500e-02 : f32
    %246 = vector.broadcast %cst_109 : f32 to vector<16x64xf32>
    %247 = arith.mulf %246, %243 : vector<16x64xf32>
    %248 = arith.mulf %247, %243 : vector<16x64xf32>
    %249 = arith.mulf %248, %243 : vector<16x64xf32>
    %250 = arith.addf %243, %249 : vector<16x64xf32>
    %cst_110 = arith.constant 0.797884583 : f32
    %251 = vector.broadcast %cst_110 : f32 to vector<16x64xf32>
    %252 = arith.mulf %251, %250 : vector<16x64xf32>
    %253 = math.tanh %252 : vector<16x64xf32>
    %cst_111 = arith.constant 1.000000e+00 : f32
    %254 = vector.broadcast %cst_111 : f32 to vector<16x64xf32>
    %255 = arith.addf %254, %253 : vector<16x64xf32>
    %256 = arith.mulf %245, %255 : vector<16x64xf32>
    %257 = vector.extract_strided_slice %6 {offsets = [64, 0], sizes = [64, 32], strides = [1, 1]} : vector<128x32xf32> to vector<64x32xf32>
    %cst_112 = arith.constant dense<0.000000e+00> : vector<16x32xf32>
    %258 = tpu.matmul %256, %257, %cst_112 {dimension_numbers = #tpu.dot_dimension_numbers<[1], [0], [0], [1], [0, 0, 1, 1], [], []>} : vector<16x64xf32>, vector<64x32xf32>, vector<16x32xf32> -> vector<16x32xf32>
    %259 = vector.broadcast %23 : vector<1x32xf32> to vector<16x32xf32>
    %260 = arith.addf %258, %259 : vector<16x32xf32>
    %261 = arith.addf %260, %239 : vector<16x32xf32>
    %cst_113 = arith.constant dense<0.000000e+00> : vector<16xf32>
    %262 = vector.multi_reduction <add>, %261, %cst_113 [1] : vector<16x32xf32> to vector<16xf32>
    %263 = vector.shape_cast %262 : vector<16xf32> to vector<16x1xf32>
    %cst_114 = arith.constant 3.200000e+01 : f32
    %264 = vector.broadcast %cst_114 : f32 to vector<16x1xf32>
    %265 = arith.divf %263, %264 : vector<16x1xf32>
    %266 = vector.broadcast %265 : vector<16x1xf32> to vector<16x32xf32>
    %267 = arith.subf %261, %266 : vector<16x32xf32>
    %268 = arith.mulf %267, %267 : vector<16x32xf32>
    %cst_115 = arith.constant dense<0.000000e+00> : vector<16xf32>
    %269 = vector.multi_reduction <add>, %268, %cst_115 [1] : vector<16x32xf32> to vector<16xf32>
    %270 = vector.shape_cast %269 : vector<16xf32> to vector<16x1xf32>
    %cst_116 = arith.constant 3.200000e+01 : f32
    %271 = vector.broadcast %cst_116 : f32 to vector<16x1xf32>
    %272 = arith.divf %270, %271 : vector<16x1xf32>
    %273 = vector.broadcast %265 : vector<16x1xf32> to vector<16x32xf32>
    %274 = arith.subf %261, %273 : vector<16x32xf32>
    %cst_117 = arith.constant 9.99999996E-13 : f32
    %275 = vector.broadcast %cst_117 : f32 to vector<16x1xf32>
    %276 = arith.addf %272, %275 : vector<16x1xf32>
    %277 = math.sqrt %276 : vector<16x1xf32>
    %278 = vector.broadcast %277 : vector<16x1xf32> to vector<16x32xf32>
    %279 = arith.divf %274, %278 : vector<16x32xf32>
    %280 = vector.broadcast %28 : vector<1x32xf32> to vector<16x32xf32>
    %281 = arith.mulf %279, %280 : vector<16x32xf32>
    %282 = vector.broadcast %29 : vector<1x32xf32> to vector<16x32xf32>
    %283 = arith.addf %281, %282 : vector<16x32xf32>
    %284 = vector.shape_cast %283 : vector<16x32xf32> to vector<2x8x32xf32>
    %c0_118 = arith.constant 0 : index
    %c0_119 = arith.constant 0 : index
    %c0_120 = arith.constant 0 : index
    %285 = vector.load %arg4[%c0_118, %c0_119, %c0_120] : memref<2x8x128xf32, #tpu.memory_space<vmem>>, vector<2x8x32xf32>
    tpu.vector_store %arg4[%c0_118, %c0_119, %c0_120], %284 {strides = array<i32>} : memref<2x8x128xf32, #tpu.memory_space<vmem>>, vector<2x8x32xf32>,
    return
  }
}

</mosaic_0001>

<bundles_post_ra>
// kernel: tpu_custom_call.1
= control target key start
LH: loop header
LB: loop body
LE: loop exit
PB: predicated region body
PF: predicated region fallthrough
CT: control target
= control target key end

     0   :  { %vm54_vm0 = vcmask 261120   ;;  %s5004_s0 = inlined_call_operand.vmem [shape: f32[40,32], index: 0, kind: input, shape index: {}]   ;;  %s5005_s1 = inlined_call_operand.vmem [shape: f32[32,256], index: 1, kind: input, shape index: {}]   ;;  %s5006_s2 = inlined_call_operand.vmem [shape: f32[128,32], index: 2, kind: input, shape index: {}]   ;;  %s5007_s3 = inlined_call_operand.vmem [shape: f32[8,128], index: 3, kind: input, shape index: {}]   ;;  %s5008_s4 = inlined_call_operand.hbm [shape: f32[2,8,128], index: 4, kind: output, shape index: {}]  }
   0x1   :  { %v31_v0 = vld [vmem:[%s5005_s1 + $0x30] sm:$0xff]  ;;  %v29_v1 = vld [vmem:[%s5005_s1 + $0x20] sm:$0xff] }
   0x2   :  { %3844 = vmatprep.subr.mxu1 %v31_v0  ;;  %v20_v2 = vld [vmem:[%s5004_s0] sm:$0xff]  ;;  %v27_v3 = vld [vmem:[%s5005_s1 + $0x10] sm:$0xff] }
   0x3   :  { %3845 = vmatpush3.msra.mxu1 %v31_v0  ;;  %3852 = vmatprep.mubr.msk.f32.mxu1 %vm54_vm0, %v20_v2 }
   0x4   :  { %9 = vsyncpa [#allocation4], 0  ;;  %3846 = vmatprep.subr.mxu1 %v29_v1  ;;  %v25_v4 = vld [vmem:[%s5005_s1] sm:$0xff]  ;;  %v21_v5 = vld [vmem:[%s5004_s0 + $0x8] sm:$0xff]  ;;  %v50_v6 = vlaneseq  ;;  %v4259_v7 = vmov 0.0   ;;  %vm4260_vm1 = vmmov 0  }
   0x5   :  { %3847 = vmatpush3.msra.mxu1 %v29_v1  ;;  %3872 = vmatprep.subr.mxu0 %v4259_v7  ;;  %18 = vst [vmem:[#allocation3] sm:$0xff] %v4259_v7  ;;  %19 = vst [vmem:[#allocation3 + $0x8] sm:$0xff] %v4259_v7  ;;  %v4339_v10 = vld [vmem:[%s5007_s3] sm:$0xff]  ;;  %s4261_s29 = smov 96   ;;  %vm238_vm2 = vcmask 64512   ;;  %v32_v26 = vld [vmem:[%s5005_s1 + $0x38] sm:$0xff] }
   0x6   :  { %3848 = vmatprep.subr.mxu1 %v27_v3  ;;  %v4329_v8 = vshrl.u32 %v50_v6, 7  ;;  %3874 = vmatprep.mubr.msk.f32.mxu0 %vm4260_vm1, %v4259_v7  ;;  %v30_v27 = vld [vmem:[%s5005_s1 + $0x28] sm:$0xff]  ;;  %v28_v28 = vld [vmem:[%s5005_s1 + $0x18] sm:$0xff]  ;;  %s4262_s12 = smov 64   ;;  %v22_v30 = vld [vmem:[%s5004_s0 + $0x10] sm:$0xff]  ;;  %s4263_s15 = smov 88  }
   0x7   :  { %3849 = vmatpush3.msra.mxu1 %v27_v3  ;;  %v26_v29 = vld [vmem:[%s5005_s1 + $0x8] sm:$0xff]  ;;  %s4264_s16 = smov 120   ;;  %v23_v43 = vld [vmem:[%s5004_s0 + $0x18] sm:$0xff]  ;;  %v24_v44 = vld [vmem:[%s5004_s0 + $0x20] sm:$0xff]  ;;  %s4265_s21 = smov 56   ;;  %vm926_vm3 = vcmask 130112  }
   0x8   :  { %3850 = vmatprep.subr.mxu1 %v25_v4  ;;  %v52_v9 = vsub.s32 0, %v4329_v8  ;;  %s4266_s22 = smov 80   ;;  %s4267_s23 = smov 112   ;;  %vm1278_vm4 = vcmask 195712   ;;  %vm1630_vm5 = vcmask 261312   ;;  %vm1935_vm6 = vcmask 97280  }
   0x9   :  { %3851 = vmatpush3.msra.mxu1 %v25_v4  ;;  %s4268_s24 = smov 48   ;;  %s4269_s25 = smov 72   ;;  %vm1976_vm7 = vcmask 1043456  }
   0xa   :  { %3853 = vmatmul.mubr.msk.f32.vlgmr.msra.gmra.mxu1 %vm54_vm0, %v21_v5  ;;  %3855 = vmatprep.subr.mxu1 %v4259_v7  ;;  %v53_v12 = vrot.slane %v4339_v10, %v52_v9  ;;  %s4270_s26 = smov 104   ;;  %s4271_s27 = smov 40  }
   0xb   :  { %3863 = vmatprep.mubr.msk.f32.mxu1 %vm4260_vm1, %v4259_v7  ;;  %3856 = vmatpush3.msra.mxu1 %v32_v26  ;;  %s4272_s28 = smov 8   ;;  %s4273_s30 = smov 16  }
   0xc   :  { %3857 = vmatprep.subr.mxu1 %v4259_v7  ;;  %s4274_s14 = smov 24   ;;  %s4275_s17 = smov 32  }
   0xd   :  { %3858 = vmatpush3.msra.mxu1 %v30_v27 }
   0xe   :  { %3859 = vmatprep.subr.mxu1 %v4259_v7 }
   0xf   :  { %3860 = vmatpush3.msra.mxu1 %v28_v28 }
  0x10   :  { %3861 = vmatprep.subr.mxu1 %v4259_v7 }
  0x11   :  { %3862 = vmatpush3.msra.mxu1 %v26_v29 }
  0x12   :  { %3887 = vmatprep.subr.mxu1 %v4259_v7  ;;  %3864 = vmatmul.mubr.msk.f32.vlgmr.msra.gmra.mxu1 %vm54_vm0, %v22_v30 }
  0x13   :  { %3866 = vmatprep.mubr.msk.f32.mxu1 %vm4260_vm1, %v4259_v7 }
  0x16   :  { %3867 = vmatmul.mubr.msk.f32.gmra.mxu1 %vm54_vm0, %v23_v43 }
  0x17   :  { %3869 = vmatprep.mubr.msk.f32.mxu1 %vm4260_vm1, %v4259_v7 }
  0x1a   :  { %3870 = vmatmul.mubr.msk.f32.gmra.mxu1 %vm54_vm0, %v24_v44 }
  0x1b   :  { %3889 = vmatprep.mubr.msk.f32.mxu1 %vm4260_vm1, %v4259_v7 }
  0xca   :  { %v3854_v11 = vpop.f32.mrf.mxu1 }
  0xcb   :  { %v4346_v15 = vadd.f32 %v3854_v11, %v53_v12 }
  0xcc   :  { %v127_v13 = vpop.f32.mrf.mxu1 }
  0xcd   :  { %v4342_v14 = vadd.f32 %v127_v13, %v53_v12 }
  0xcf   :  { %236 = vrot.lane.b32.xlu0 %v4342_v14, %s4261_s29 }
  0xd2   :  { %v4414_v45 = vpop.f32.mrf.mxu1 }
  0xd3   :  { %314 = vrot.lane.b32.xlu0 %v4346_v15, %s4261_s29 }
  0xd4   :  { %v3865_v46 = vpop.f32.mrf.mxu1 }
  0xd6   :  { %v4438_v57 = vpop.f32.mrf.mxu1 }
  0xd8   :  { %v3868_v58 = vpop.f32.mrf.mxu1 }
  0xda   :  { %v4440_v59 = vpop.f32.mrf.mxu1 }
  0xdc   :  { %v3871_v60 = vpop.f32.mrf.mxu1 }
 0x141   :  { %v237_v16 = vpop.permute.xlu0 %236 }
 0x142   :  { %3873 = vmatpush3.xpose.msk.msra.mxu0 %vm238_vm2, %v237_v16 }
 0x143   :  { %3877 = vmatprep.subr.mxu0 %v4259_v7 }
 0x145   :  { %v315_v17 = vpop.permute.xlu0 %314  ;;  %3875 = vmatmul.mubr.msk.f32.vlgmr.msra.gmra.mxu0 %vm238_vm2, %v4342_v14 }
 0x146   :  { %3878 = vmatpush3.xpose.msk.msra.mxu0 %vm238_vm2, %v315_v17  ;;  %3879 = vmatprep.mubr.msk.f32.mxu0 %vm4260_vm1, %v4259_v7 }
 0x147   :  { %3882 = vmatprep.subr.mxu0 %v4259_v7 }
 0x149   :  { %3880 = vmatmul.mubr.msk.f32.vlgmr.msra.gmra.mxu0 %vm238_vm2, %v4346_v15 }
 0x14a   :  { %3884 = vmatprep.mubr.msk.f32.mxu0 %vm4260_vm1, %v4259_v7 }
 0x205   :  { %v309_v18 = vpop.f32.mrf.mxu0 }
 0x206   :  { %v390_v19 = vmul.f32 0.35355338, %v309_v18 }
 0x207   :  { %v3876_v20 = vpop.f32.mrf.mxu0 }
 0x208   :  { %v392_v21 = vsel %vm238_vm2, %v390_v19, -inf }
 0x209   :  { %393 = vmax.xlane.f32.xlu1 %v392_v21  ;;  %v386_v22 = vpop.f32.mrf.mxu0 }
 0x20a   :  { %v391_v23 = vmul.f32 0.35355338, %v386_v22 }
 0x20b   :  { %v3881_v24 = vpop.f32.mrf.mxu0 }
 0x20c   :  { %v395_v25 = vsel %vm238_vm2, %v391_v23, -inf }
 0x20d   :  { %396 = vmax.xlane.f32.xlu1 %v395_v25 }
 0x21e   :  { %425 = vrot.lane.b32.xlu1 %v4342_v14, %s4262_s12 }
 0x222   :  { %500 = vrot.lane.b32.xlu1 %v4346_v15, %s4262_s12 }
 0x226   :  { %579 = vrot.lane.b32.xlu1 %v4342_v14, %s4263_s15 }
 0x22a   :  { %657 = vrot.lane.b32.xlu1 %v4346_v15, %s4263_s15 }
 0x292   :  { %v394_v31 = vpop.xlane.xlu1 %393 }
 0x293   :  { %v398_v32 = vsub.f32 %v390_v19, %v394_v31 }
 0x295   :  { %v400_v33 = vmul.f32 1.442695, %v398_v32 }
 0x296   :  { %v397_v34 = vpop.xlane.xlu1 %396 }
 0x297   :  { %4137 = vpow2.f32 %v400_v33  ;;  %v399_v35 = vsub.f32 %v391_v23, %v397_v34 }
 0x299   :  { %v402_v36 = vmul.f32 1.442695, %v399_v35 }
 0x29a   :  { %v426_v37 = vpop.permute.xlu1 %425 }
 0x29b   :  { %4139 = vpow2.f32 %v402_v36  ;;  %3883 = vmatpush3.msra.mxu0 %v426_v37 }
 0x29c   :  { %3892 = vmatprep.subr.mxu0 %v4259_v7 }
 0x29e   :  { %v501_v38 = vpop.permute.xlu1 %500 }
 0x29f   :  { %3888 = vmatpush3.msra.mxu1 %v501_v38 }
 0x2a0   :  { %3897 = vmatprep.subr.mxu1 %v4259_v7 }
 0x2a2   :  { %v580_v47 = vpop.permute.xlu1 %579 }
 0x2a4   :  { %v4138_v39 = vpop.eup %4137 }
 0x2a5   :  { %v404_v40 = vsel %vm238_vm2, %v4138_v39, 0.0 }
 0x2a6   :  { %405 = vadd.xlane.f32.xlu0 %v404_v40  ;;  %v658_v48 = vpop.permute.xlu1 %657 }
 0x2a8   :  { %v4140_v41 = vpop.eup %4139 }
 0x2a9   :  { %v407_v42 = vsel %vm238_vm2, %v4140_v41, 0.0 }
 0x2aa   :  { %408 = vadd.xlane.f32.xlu1 %v407_v42 }
 0x2bb   :  { %655 = vrot.lane.b32.xlu1 %v4346_v15, %s4264_s16 }
 0x2bc   :  { %577 = vrot.lane.b32.xlu0 %v4342_v14, %s4264_s16 }
 0x32f   :  { %v406_v49 = vpop.xlane.xlu0 %405 }
 0x330   :  { %4141 = vrcp.f32 %v406_v49 }
 0x333   :  { %v409_v50 = vpop.xlane.xlu1 %408  ;;  %v578_v55 = vpop.permute.xlu0 %577 }
 0x334   :  { %4143 = vrcp.f32 %v409_v50 }
 0x337   :  { %v656_v56 = vpop.permute.xlu1 %655 }
 0x33d   :  { %v4142_v51 = vpop.eup %4141 }
 0x33e   :  { %v4416_v52 = vmul.f32 %v4142_v51, %v4138_v39 }
 0x340   :  { %3885 = vmatmul.mubr.msk.f32.vlgmr.msra.gmra.mxu0 %vm238_vm2, %v4416_v52 }
 0x341   :  { %v4144_v53 = vpop.eup %4143  ;;  %3893 = vmatpush3.xpose.msk.msra.mxu0 %vm238_vm2, %v580_v47  ;;  %3894 = vmatprep.mubr.msk.f32.mxu0 %vm4260_vm1, %v4259_v7 }
 0x342   :  { %v4423_v54 = vmul.f32 %v4144_v53, %v4140_v41  ;;  %3902 = vmatprep.subr.mxu0 %v4259_v7 }
 0x344   :  { %3890 = vmatmul.mubr.msk.f32.vlgmr.msra.gmra.mxu1 %vm238_vm2, %v4423_v54  ;;  %3895 = vmatmul.mubr.msk.f32.vlgmr.msra.gmra.mxu0 %vm238_vm2, %v578_v55 }
 0x345   :  { %3898 = vmatpush3.xpose.msk.msra.mxu1 %vm238_vm2, %v658_v48  ;;  %3899 = vmatprep.mubr.msk.f32.mxu1 %vm4260_vm1, %v4259_v7 }
 0x346   :  { %3907 = vmatprep.subr.mxu1 %v4259_v7  ;;  %3904 = vmatprep.mubr.msk.f32.mxu0 %vm4260_vm1, %v4259_v7 }
 0x348   :  { %3900 = vmatmul.mubr.msk.f32.vlgmr.msra.gmra.mxu1 %vm238_vm2, %v656_v56 }
 0x349   :  { %3909 = vmatprep.mubr.msk.f32.mxu1 %vm4260_vm1, %v4259_v7 }
 0x400   :  { %v496_v61 = vpop.f32.mrf.mxu0 }
 0x401   :  { %575 = vst.msk [vmem:[#allocation2] sm:$0xff] %vm238_vm2, %v496_v61 }
 0x402   :  { %v3886_v62 = vpop.f32.mrf.mxu0 }
 0x404   :  { %v571_v63 = vpop.f32.mrf.mxu1  ;;  %v651_v0 = vpop.f32.mrf.mxu0 }
 0x405   :  { %576 = vst.msk [vmem:[#allocation2 + $0x8] sm:$0xff] %vm238_vm2, %v571_v63  ;;  %v733_v1 = vmul.f32 0.35355338, %v651_v0 }
 0x406   :  { %v3891_v2 = vpop.f32.mrf.mxu1  ;;  %v3896_v3 = vpop.f32.mrf.mxu0 }
 0x407   :  { %v735_v4 = vsel %vm238_vm2, %v733_v1, -inf }
 0x408   :  { %736 = vmax.xlane.f32.xlu1 %v735_v4  ;;  %v729_v5 = vpop.f32.mrf.mxu1 }
 0x409   :  { %v734_v6 = vmul.f32 0.35355338, %v729_v5 }
 0x40a   :  { %v3901_v9 = vpop.f32.mrf.mxu1 }
 0x40b   :  { %v738_v11 = vsel %vm238_vm2, %v734_v6, -inf }
 0x40c   :  { %739 = vmax.xlane.f32.xlu0 %v738_v11 }
 0x419   :  { %768 = vrot.lane.b32.xlu1 %v4342_v14, %s4265_s21 }
 0x41d   :  { %931 = vrot.lane.b32.xlu1 %v4342_v14, %s4266_s22 }
 0x421   :  { %1009 = vrot.lane.b32.xlu1 %v4346_v15, %s4266_s22 }
 0x422   :  { %843 = vrot.lane.b32.xlu0 %v4346_v15, %s4265_s21 }
 0x426   :  { %929 = vrot.lane.b32.xlu0 %v4342_v14, %s4267_s23 }
 0x491   :  { %v737_v12 = vpop.xlane.xlu1 %736 }
 0x492   :  { %v741_v13 = vsub.f32 %v733_v1, %v737_v12 }
 0x494   :  { %v743_v16 = vmul.f32 1.442695, %v741_v13 }
 0x495   :  { %v769_v17 = vpop.permute.xlu1 %768  ;;  %v740_v18 = vpop.xlane.xlu0 %739 }
 0x496   :  { %4145 = vpow2.f32 %v743_v16  ;;  %v742_v19 = vsub.f32 %v734_v6, %v740_v18  ;;  %3903 = vmatpush3.msra.mxu0 %v769_v17 }
 0x497   :  { %3912 = vmatprep.subr.mxu0 %v4259_v7 }
 0x498   :  { %v745_v20 = vmul.f32 1.442695, %v742_v19 }
 0x499   :  { %v844_v21 = vpop.permute.xlu0 %843  ;;  %v932_v26 = vpop.permute.xlu1 %931 }
 0x49a   :  { %4147 = vpow2.f32 %v745_v20  ;;  %3908 = vmatpush3.msra.mxu1 %v844_v21 }
 0x49b   :  { %3917 = vmatprep.subr.mxu1 %v4259_v7 }
 0x49d   :  { %v1010_v27 = vpop.permute.xlu1 %1009  ;;  %v930_v34 = vpop.permute.xlu0 %929 }
 0x4a3   :  { %v4146_v22 = vpop.eup %4145 }
 0x4a4   :  { %v747_v23 = vsel %vm238_vm2, %v4146_v22, 0.0 }
 0x4a5   :  { %748 = vadd.xlane.f32.xlu1 %v747_v23 }
 0x4a7   :  { %v4148_v24 = vpop.eup %4147 }
 0x4a8   :  { %v750_v25 = vsel %vm238_vm2, %v4148_v24, 0.0 }
 0x4a9   :  { %751 = vadd.xlane.f32.xlu1 %v750_v25 }
 0x4ba   :  { %1007 = vrot.lane.b32.xlu1 %v4346_v15, %s4267_s23 }
 0x52e   :  { %v749_v28 = vpop.xlane.xlu1 %748 }
 0x52f   :  { %4149 = vrcp.f32 %v749_v28 }
 0x532   :  { %v752_v29 = vpop.xlane.xlu1 %751 }
 0x533   :  { %4151 = vrcp.f32 %v752_v29 }
 0x536   :  { %v1008_v35 = vpop.permute.xlu1 %1007 }
 0x53c   :  { %v4150_v30 = vpop.eup %4149 }
 0x53d   :  { %v4462_v31 = vmul.f32 %v4150_v30, %v4146_v22 }
 0x53f   :  { %3905 = vmatmul.mubr.msk.f32.vlgmr.msra.gmra.mxu0 %vm238_vm2, %v4462_v31 }
 0x540   :  { %v4152_v32 = vpop.eup %4151  ;;  %3913 = vmatpush3.xpose.msk.msra.mxu0 %vm238_vm2, %v932_v26  ;;  %3914 = vmatprep.mubr.msk.f32.mxu0 %vm4260_vm1, %v4259_v7 }
 0x541   :  { %v4469_v33 = vmul.f32 %v4152_v32, %v4148_v24  ;;  %3922 = vmatprep.subr.mxu0 %v4259_v7 }
 0x543   :  { %3910 = vmatmul.mubr.msk.f32.vlgmr.msra.gmra.mxu1 %vm238_vm2, %v4469_v33  ;;  %3915 = vmatmul.mubr.msk.f32.vlgmr.msra.gmra.mxu0 %vm238_vm2, %v930_v34 }
 0x544   :  { %3918 = vmatpush3.xpose.msk.msra.mxu1 %vm238_vm2, %v1010_v27  ;;  %3919 = vmatprep.mubr.msk.f32.mxu1 %vm4260_vm1, %v4259_v7 }
 0x545   :  { %3927 = vmatprep.subr.mxu1 %v4259_v7  ;;  %3924 = vmatprep.mubr.msk.f32.mxu0 %vm4260_vm1, %v4259_v7 }
 0x547   :  { %3920 = vmatmul.mubr.msk.f32.vlgmr.msra.gmra.mxu1 %vm238_vm2, %v1008_v35 }
 0x548   :  { %3929 = vmatprep.mubr.msk.f32.mxu1 %vm4260_vm1, %v4259_v7 }
 0x5ff   :  { %v4484_v36 = vpop.f32.mrf.mxu0 }
 0x601   :  { %v3906_v37 = vpop.f32.mrf.mxu0 }
 0x603   :  { %v4486_v38 = vpop.f32.mrf.mxu1  ;;  %v1003_v39 = vpop.f32.mrf.mxu0 }
 0x604   :  { %v1085_v40 = vmul.f32 0.35355338, %v1003_v39 }
 0x605   :  { %v3911_v41 = vpop.f32.mrf.mxu1  ;;  %v3916_v42 = vpop.f32.mrf.mxu0 }
 0x606   :  { %v1087_v43 = vsel %vm238_vm2, %v1085_v40, -inf }
 0x607   :  { %1088 = vmax.xlane.f32.xlu0 %v1087_v43  ;;  %v1081_v44 = vpop.f32.mrf.mxu1 }
 0x608   :  { %v1086_v46 = vmul.f32 0.35355338, %v1081_v44 }
 0x609   :  { %v3921_v47 = vpop.f32.mrf.mxu1 }
 0x60a   :  { %v1090_v48 = vsel %vm238_vm2, %v1086_v46, -inf  ;;  %v138_v47 = vsub.s32 1, %v4329_v8 }
 0x60b   :  { %1091 = vmax.xlane.f32.xlu1 %v1090_v48 }
 0x61c   :  { %1120 = vrot.lane.b32.xlu1 %v4342_v14, %s4268_s24 }
 0x61d   :  { %1195 = vrot.lane.b32.xlu0 %v4346_v15, %s4268_s24 }
 0x620   :  { %1283 = vrot.lane.b32.xlu1 %v4342_v14, %s4269_s25 }
 0x624   :  { %1361 = vrot.lane.b32.xlu1 %v4346_v15, %s4269_s25 }
 0x628   :  { %1359 = vrot.lane.b32.xlu1 %v4346_v15, %s4270_s26 }
 0x690   :  { %v1089_v49 = vpop.xlane.xlu0 %1088 }
 0x691   :  { %v1093_v50 = vsub.f32 %v1085_v40, %v1089_v49  ;;  %v4548_v49 = vrot.slane %v4339_v10, %v138_v47 }
 0x693   :  { %v1095_v51 = vmul.f32 1.442695, %v1093_v50  ;;  %v4561_v10 = vadd.f32 %v4438_v57, %v4548_v49  ;;  %v36_v57 = vld [vmem:[%s5006_s2 + $0x18] sm:$0xff] }
 0x694   :  { %v1196_v53 = vpop.permute.xlu0 %1195  ;;  %v1092_v55 = vpop.xlane.xlu1 %1091 }
 0x695   :  { %4153 = vpow2.f32 %v1095_v51  ;;  %v1094_v56 = vsub.f32 %v1086_v46, %v1092_v55  ;;  %3928 = vmatpush3.msra.mxu1 %v1196_v53  ;;  %v216_v55 = vadd.f32 %v4414_v45, %v4548_v49 }
 0x696   :  { %3937 = vmatprep.subr.mxu1 %v4259_v7 }
 0x697   :  { %v1097_v58 = vmul.f32 1.442695, %v1094_v56 }
 0x698   :  { %v1121_v60 = vpop.permute.xlu1 %1120 }
 0x699   :  { %4155 = vpow2.f32 %v1097_v58  ;;  %3923 = vmatpush3.msra.mxu0 %v1121_v60  ;;  %v232_v60 = vcombine.high %v216_v55, %v216_v55 }
 0x69a   :  { %3932 = vmatprep.subr.mxu0 %v4259_v7 }
 0x69b   :  { %v4570_v45 = vcombine.low %v216_v55, %v232_v60 }
 0x69c   :  { %v1284_v3 = vpop.permute.xlu1 %1283 }
 0x6a0   :  { %v1362_v9 = vpop.permute.xlu1 %1361 }
 0x6a2   :  { %v4154_v61 = vpop.eup %4153 }
 0x6a3   :  { %v1099_v62 = vsel %vm238_vm2, %v4154_v61, 0.0 }
 0x6a4   :  { %1100 = vadd.xlane.f32.xlu0 %v1099_v62  ;;  %v1360_v13 = vpop.permute.xlu1 %1359  ;;  %v34_v62 = vld [vmem:[%s5006_s2 + $0x8] sm:$0xff] }
 0x6a6   :  { %v4156_v63 = vpop.eup %4155 }
 0x6a7   :  { %v1102_v0 = vsel %vm238_vm2, %v4156_v63, 0.0 }
 0x6a8   :  { %1103 = vadd.xlane.f32.xlu0 %v1102_v0 }
 0x6be   :  { %1281 = vrot.lane.b32.xlu0 %v4342_v14, %s4270_s26 }
 0x72d   :  { %v1101_v1 = vpop.xlane.xlu0 %1100 }
 0x72e   :  { %4157 = vrcp.f32 %v1101_v1 }
 0x731   :  { %v1104_v2 = vpop.xlane.xlu0 %1103 }
 0x732   :  { %4159 = vrcp.f32 %v1104_v2 }
 0x735   :  { %v1282_v12 = vpop.permute.xlu0 %1281 }
 0x73b   :  { %v4158_v4 = vpop.eup %4157 }
 0x73c   :  { %v4506_v5 = vmul.f32 %v4158_v4, %v4154_v61  ;;  %v35_v61 = vld [vmem:[%s5006_s2 + $0x10] sm:$0xff] }
 0x73e   :  { %3925 = vmatmul.mubr.msk.f32.vlgmr.msra.gmra.mxu0 %vm238_vm2, %v4506_v5 }
 0x73f   :  { %v4160_v6 = vpop.eup %4159  ;;  %3933 = vmatpush3.xpose.msk.msra.mxu0 %vm238_vm2, %v1284_v3  ;;  %3934 = vmatprep.mubr.msk.f32.mxu0 %vm4260_vm1, %v4259_v7 }
 0x740   :  { %v4513_v11 = vmul.f32 %v4160_v6, %v4156_v63  ;;  %3942 = vmatprep.subr.mxu0 %v4259_v7  ;;  %v33_v63 = vld [vmem:[%s5006_s2] sm:$0xff] }
 0x742   :  { %3930 = vmatmul.mubr.msk.f32.vlgmr.msra.gmra.mxu1 %vm238_vm2, %v4513_v11  ;;  %3935 = vmatmul.mubr.msk.f32.vlgmr.msra.gmra.mxu0 %vm238_vm2, %v1282_v12 }
 0x743   :  { %3938 = vmatpush3.xpose.msk.msra.mxu1 %vm238_vm2, %v1362_v9  ;;  %3939 = vmatprep.mubr.msk.f32.mxu1 %vm4260_vm1, %v4259_v7 }
 0x744   :  { %3947 = vmatprep.subr.mxu1 %v4259_v7  ;;  %3944 = vmatprep.mubr.msk.f32.mxu0 %vm4260_vm1, %v4259_v7 }
 0x746   :  { %3940 = vmatmul.mubr.msk.f32.vlgmr.msra.gmra.mxu1 %vm238_vm2, %v1360_v13  ;;  %v226_v13 = vadd.f32 %v4440_v59, %v4548_v49 }
 0x747   :  { %3949 = vmatprep.mubr.msk.f32.mxu1 %vm4260_vm1, %v4259_v7 }
 0x7fe   :  { %v1191_v16 = vpop.f32.mrf.mxu0 }
 0x800   :  { %v3926_v17 = vpop.f32.mrf.mxu0 }
 0x801   :  { %v4604_v17 = vcombine.high %v226_v13, %v226_v13 }
 0x802   :  { %v1266_v18 = vpop.f32.mrf.mxu1  ;;  %v1355_v19 = vpop.f32.mrf.mxu0 }
 0x803   :  { %v1437_v20 = vmul.f32 0.35355338, %v1355_v19 }
 0x804   :  { %v3931_v21 = vpop.f32.mrf.mxu1  ;;  %v3936_v22 = vpop.f32.mrf.mxu0 }
 0x805   :  { %v1439_v23 = vsel %vm238_vm2, %v1437_v20, -inf }
 0x806   :  { %1440 = vmax.xlane.f32.xlu0 %v1439_v23  ;;  %v1433_v24 = vpop.f32.mrf.mxu1 }
 0x807   :  { %v1438_v25 = vmul.f32 0.35355338, %v1433_v24 }
 0x808   :  { %v3941_v26 = vpop.f32.mrf.mxu1 }
 0x809   :  { %v1442_v27 = vsel %vm238_vm2, %v1438_v25, -inf }
 0x80a   :  { %1443 = vmax.xlane.f32.xlu1 %v1442_v27 }
 0x81b   :  { %1472 = vrot.lane.b32.xlu1 %v4342_v14, %s4271_s27 }
 0x81f   :  { %920 = vrot.lane.b32.xlu1 %v4484_v36, %s4272_s28 }
 0x823   :  { %922 = vrot.lane.b32.xlu1 %v4486_v38, %s4272_s28 }
 0x827   :  { %1274 = vrot.lane.b32.xlu1 %v1266_v18, %s4273_s30 }
 0x88f   :  { %v1441_v28 = vpop.xlane.xlu0 %1440 }
 0x890   :  { %v1445_v29 = vsub.f32 %v1437_v20, %v1441_v28 }
 0x892   :  { %v1447_v30 = vmul.f32 1.442695, %v1445_v29 }
 0x893   :  { %v1444_v32 = vpop.xlane.xlu1 %1443 }
 0x894   :  { %4161 = vpow2.f32 %v1447_v30  ;;  %v1446_v34 = vsub.f32 %v1438_v25, %v1444_v32 }
 0x896   :  { %v1449_v35 = vmul.f32 1.442695, %v1446_v34 }
 0x897   :  { %v1473_v37 = vpop.permute.xlu1 %1472 }
 0x898   :  { %4163 = vpow2.f32 %v1449_v35  ;;  %3943 = vmatpush3.msra.mxu0 %v1473_v37 }
 0x899   :  { %3952 = vmatprep.subr.mxu0 %v36_v57 }
 0x89b   :  { %v921_v39 = vpop.permute.xlu1 %920 }
 0x89c   :  { %927 = vst.msk [vmem:[#allocation2] sm:$0xff] %vm926_vm3, %v921_v39 }
 0x89f   :  { %v923_v36 = vpop.permute.xlu1 %922 }
 0x8a0   :  { %928 = vst.msk [vmem:[#allocation2 + $0x8] sm:$0xff] %vm926_vm3, %v923_v36 }
 0x8a1   :  { %v4162_v38 = vpop.eup %4161 }
 0x8a2   :  { %v1451_v40 = vsel %vm238_vm2, %v4162_v38, 0.0 }
 0x8a3   :  { %1452 = vadd.xlane.f32.xlu0 %v1451_v40  ;;  %v1275_v41 = vpop.permute.xlu1 %1274 }
 0x8a4   :  { %1280 = vst.msk [vmem:[#allocation2 + $0x8] sm:$0xff] %vm1278_vm4, %v1275_v41 }
 0x8a5   :  { %v4164_v42 = vpop.eup %4163 }
 0x8a6   :  { %v1454_v43 = vsel %vm238_vm2, %v4164_v42, 0.0 }
 0x8a7   :  { %1455 = vadd.xlane.f32.xlu0 %v1454_v43 }
 0x8bd   :  { %1547 = vrot.lane.b32.xlu0 %v4346_v15, %s4271_s27 }
 0x8c1   :  { %1272 = vrot.lane.b32.xlu0 %v1191_v16, %s4273_s30  ;;  %v233_v16 = vcombine.high %v4561_v10, %v4561_v10 }
 0x8c3   :  { %v4612_v19 = vcombine.low %v233_v16, %v226_v13 }
 0x92c   :  { %v1453_v44 = vpop.xlane.xlu0 %1452 }
 0x92d   :  { %4165 = vrcp.f32 %v1453_v44 }
 0x930   :  { %v1456_v46 = vpop.xlane.xlu0 %1455 }
 0x931   :  { %4167 = vrcp.f32 %v1456_v46 }
 0x934   :  { %v1548_v48 = vpop.permute.xlu0 %1547 }
 0x935   :  { %3948 = vmatpush3.msra.mxu1 %v1548_v48 }
 0x936   :  { %3963 = vmatprep.subr.mxu1 %v4259_v7 }
 0x938   :  { %v1273_v50 = vpop.permute.xlu0 %1272 }
 0x939   :  { %1279 = vst.msk [vmem:[#allocation2] sm:$0xff] %vm1278_vm4, %v1273_v50 }
 0x93a   :  { %v4166_v51 = vpop.eup %4165 }
 0x93b   :  { %v4551_v53 = vmul.f32 %v4166_v51, %v4162_v38 }
 0x93d   :  { %3945 = vmatmul.mubr.msk.f32.vlgmr.msra.gmra.mxu0 %vm238_vm2, %v4551_v53 }
 0x93e   :  { %v4168_v56 = vpop.eup %4167  ;;  %3953 = vmatpush3.msra.mxu0 %v36_v57 }
 0x93f   :  { %v4557_v58 = vmul.f32 %v4168_v56, %v4164_v42  ;;  %3954 = vmatprep.subr.mxu0 %v35_v61 }
 0x940   :  { %3955 = vmatpush3.msra.mxu0 %v35_v61 }
 0x941   :  { %3950 = vmatmul.mubr.msk.f32.vlgmr.msra.gmra.mxu1 %vm238_vm2, %v4557_v58  ;;  %3956 = vmatprep.subr.mxu0 %v34_v62 }
 0x942   :  { %3964 = vmatpush3.xpose.msk.msra.mxu1 %vm238_vm2, %v4561_v10  ;;  %3967 = vmatprep.mubr.msk.f32.mxu1 %vm4260_vm1, %v4259_v7 }
 0x943   :  { %3965 = vmatprep.subr.mxu1 %v4259_v7  ;;  %3957 = vmatpush3.msra.mxu0 %v34_v62 }
 0x944   :  { %3958 = vmatprep.subr.mxu0 %v33_v63 }
 0x945   :  { %3959 = vmatpush3.msra.mxu0 %v33_v63 }
 0x946   :  { %3966 = vmatpush3.xpose.msk.msra.mxu1 %vm238_vm2, %v4570_v45  ;;  %3970 = vmatprep.subr.mxu0 %v4259_v7 }
 0x947   :  { %3977 = vmatprep.subr.mxu1 %v4259_v7 }
 0x9fd   :  { %v1543_v0 = vpop.f32.mrf.mxu0 }
 0x9fe   :  { %1624 = vrot.lane.b32.xlu0 %v1543_v0, %s4274_s14 }
 0x9ff   :  { %v3946_v1 = vpop.f32.mrf.mxu0 }
 0xa01   :  { %v1618_v2 = vpop.f32.mrf.mxu1 }
 0xa02   :  { %1775 = vrot.lane.b32.xlu0 %v4342_v14, %s4275_s17  ;;  %1626 = vrot.lane.b32.xlu1 %v1618_v2, %s4274_s14 }
 0xa03   :  { %v3951_v3 = vpop.f32.mrf.mxu1 }
 0xa06   :  { %1854 = vrot.lane.b32.xlu1 %v4346_v15, %s4275_s17 }
 0xa70   :  { %v1625_v4 = vpop.permute.xlu0 %1624 }
 0xa71   :  { %1631 = vst.msk [vmem:[#allocation2] sm:$0xff] %vm1630_vm5, %v1625_v4 }
 0xa74   :  { %v1776_v6 = vpop.permute.xlu0 %1775  ;;  %v1627_v9 = vpop.permute.xlu1 %1626 }
 0xa75   :  { %1632 = vst.msk [vmem:[#allocation2 + $0x8] sm:$0xff] %vm1630_vm5, %v1627_v9  ;;  %3968 = vmatmul.mubr.msk.f32.vlgmr.msra.gmra.mxu1 %vm238_vm2, %v1776_v6 }
 0xa76   :  { %3981 = vmatprep.mubr.msk.f32.mxu1 %vm4260_vm1, %v4259_v7 }
 0xa78   :  { %v1633_v12 = vld [vmem:[#allocation2] sm:$0xff]  ;;  %v1855_v59 = vpop.permute.xlu1 %1854 }
 0xa79   :  { %3960 = vmatprep.mubr.msk.f32.mxu0 %vm54_vm0, %v1633_v12 }
 0xa7c   :  { %v1634_v18 = vld [vmem:[#allocation2 + $0x8] sm:$0xff] }
 0xa7d   :  { %3961 = vmatmul.mubr.msk.f32.vlgmr.msra.gmra.mxu0 %vm54_vm0, %v1634_v18 }
 0xa7e   :  { %3971 = vmatpush3.xpose.msk.msra.mxu0 %vm238_vm2, %v4604_v17  ;;  %3974 = vmatprep.mubr.msk.f32.mxu0 %vm4260_vm1, %v4259_v7 }
 0xa7f   :  { %3972 = vmatprep.subr.mxu0 %v4259_v7 }
 0xa82   :  { %3973 = vmatpush3.xpose.msk.msra.mxu0 %vm238_vm2, %v4612_v19 }
 0xa83   :  { %3991 = vmatprep.subr.mxu0 %v4259_v7 }
 0xa85   :  { %3975 = vmatmul.mubr.msk.f32.vlgmr.msra.gmra.mxu0 %vm238_vm2, %v1855_v59 }
 0xa86   :  { %3995 = vmatprep.mubr.msk.f32.mxu0 %vm4260_vm1, %v4259_v7 }
 0xb35   :  { %v1850_v20 = vpop.f32.mrf.mxu1 }
 0xb36   :  { %v1933_v21 = vmul.f32 0.35355338, %v1850_v20 }
 0xb37   :  { %v3969_v22 = vpop.f32.mrf.mxu1 }
 0xb38   :  { %v1936_v23 = vsel %vm1935_vm6, %v1933_v21, -inf }
 0xb39   :  { %1937 = vmax.xlane.f32.xlu0 %v1936_v23 }
 0xb3d   :  { %v4621_v24 = vpop.f32.mrf.mxu0 }
 0xb3f   :  { %v4623_v25 = vpop.f32.mrf.mxu0 }
 0xb45   :  { %v1929_v26 = vpop.f32.mrf.mxu0 }
 0xb46   :  { %v1934_v27 = vmul.f32 0.35355338, %v1929_v26 }
 0xb47   :  { %v3976_v28 = vpop.f32.mrf.mxu0 }
 0xb48   :  { %v1939_v29 = vsel %vm1935_vm6, %v1934_v27, -inf }
 0xb49   :  { %1940 = vmax.xlane.f32.xlu1 %v1939_v29 }
 0xb5a   :  { %1971 = vrot.lane.b32.xlu1 %v4561_v10, %s4261_s29 }
 0xb5e   :  { %2051 = vrot.lane.b32.xlu1 %v4604_v17, %s4261_s29 }
 0xb62   :  { %2049 = vrot.lane.b32.xlu1 %v4612_v19, %s4261_s29 }
 0xb66   :  { %2216 = vrot.lane.b32.xlu1 %v4604_v17, %s4264_s16 }
 0xb6a   :  { %2214 = vrot.lane.b32.xlu1 %v4612_v19, %s4264_s16 }
 0xb6e   :  { %2212 = vrot.lane.b32.xlu1 %v4346_v15, %s4274_s14 }
 0xbc2   :  { %v1938_v30 = vpop.xlane.xlu0 %1937 }
 0xbc3   :  { %v1942_v32 = vsub.f32 %v1933_v21, %v1938_v30 }
 0xbc5   :  { %v1944_v34 = vmul.f32 1.442695, %v1942_v32 }
 0xbc7   :  { %4169 = vpow2.f32 %v1944_v34 }
 0xbd2   :  { %v1941_v35 = vpop.xlane.xlu1 %1940 }
 0xbd3   :  { %v1943_v38 = vsub.f32 %v1934_v27, %v1941_v35 }
 0xbd4   :  { %v4170_v37 = vpop.eup %4169 }
 0xbd5   :  { %v1948_v39 = vsel %vm1935_vm6, %v4170_v37, 0.0  ;;  %v1946_v40 = vmul.f32 1.442695, %v1943_v38 }
 0xbd6   :  { %v1972_v36 = vpop.permute.xlu1 %1971  ;;  %1949 = vadd.xlane.f32.xlu0 %v1948_v39 }
 0xbd7   :  { %3978 = vmatpush3.msk.msra.mxu1 %vm1976_vm7, %v1972_v36  ;;  %4171 = vpow2.f32 %v1946_v40 }
 0xbd8   :  { %3979 = vmatprep.subr.mxu1 %v4259_v7 }
 0xbda   :  { %v2052_v47 = vpop.permute.xlu1 %2051 }
 0xbde   :  { %v2050_v51 = vpop.permute.xlu1 %2049 }
 0xbe2   :  { %v2217_v57 = vpop.permute.xlu1 %2216 }
 0xbe4   :  { %v4172_v41 = vpop.eup %4171 }
 0xbe5   :  { %v1951_v42 = vsel %vm1935_vm6, %v4172_v41, 0.0 }
 0xbe6   :  { %v2215_v63 = vpop.permute.xlu1 %2214 }
 0xbea   :  { %v2213_v0 = vpop.permute.xlu1 %2212 }
 0xbec   :  { %1969 = vrot.lane.b32.xlu0 %v4570_v45, %s4261_s29 }
 0xbf0   :  { %2134 = vrot.lane.b32.xlu0 %v4561_v10, %s4264_s16 }
 0xc0f   :  { %1952 = vadd.xlane.f32.xlu0 %v1951_v42 }
 0xc25   :  { %2132 = vrot.lane.b32.xlu0 %v4570_v45, %s4264_s16 }
 0xc29   :  { %2130 = vrot.lane.b32.xlu0 %v4342_v14, %s4274_s14 }
 0xc5f   :  { %v1950_v43 = vpop.xlane.xlu0 %1949 }
 0xc60   :  { %4173 = vrcp.f32 %v1950_v43  ;;  %v4717_v43 = vld [vmem:[#allocation3] sm:$0xff] }
 0xc63   :  { %v1970_v44 = vpop.permute.xlu0 %1969 }
 0xc64   :  { %3980 = vmatpush3.msra.mxu1 %v1970_v44 }
 0xc65   :  { %3984 = vmatprep.subr.mxu1 %v4259_v7 }
 0xc67   :  { %v2135_v46 = vpop.permute.xlu0 %2134 }
 0xc68   :  { %3992 = vmatpush3.xpose.msk.msra.mxu0 %vm238_vm2, %v2135_v46 }
 0xc69   :  { %3993 = vmatprep.subr.mxu0 %v4259_v7 }
 0xc6d   :  { %v4174_v48 = vpop.eup %4173 }
 0xc6e   :  { %v4653_v50 = vmul.f32 %v4174_v48, %v4170_v37 }
 0xc70   :  { %3982 = vmatmul.mubr.msk.f32.vlgmr.msra.gmra.mxu1 %vm1935_vm6, %v4653_v50 }
 0xc71   :  { %3985 = vmatpush3.msk.msra.mxu1 %vm1976_vm7, %v2052_v47  ;;  %3988 = vmatprep.mubr.msk.f32.mxu1 %vm4260_vm1, %v4259_v7 }
 0xc72   :  { %3986 = vmatprep.subr.mxu1 %v4259_v7 }
 0xc73   :  { %3987 = vmatpush3.msra.mxu1 %v2050_v51 }
 0xc74   :  { %3998 = vmatprep.subr.mxu1 %v4259_v7 }
 0xc98   :  { %v1953_v55 = vpop.xlane.xlu0 %1952 }
 0xc99   :  { %4175 = vrcp.f32 %v1953_v55 }
 0xc9c   :  { %v2133_v56 = vpop.permute.xlu0 %2132 }
 0xc9d   :  { %3994 = vmatpush3.xpose.msk.msra.mxu0 %vm238_vm2, %v2133_v56 }
 0xc9e   :  { %4005 = vmatprep.subr.mxu0 %v4259_v7 }
 0xca0   :  { %v2131_v60 = vpop.permute.xlu0 %2130 }
 0xca1   :  { %3996 = vmatmul.mubr.msk.f32.vlgmr.msra.gmra.mxu0 %vm238_vm2, %v2131_v60 }
 0xca2   :  { %4009 = vmatprep.mubr.msk.f32.mxu0 %vm4260_vm1, %v4259_v7 }
 0xca6   :  { %v4176_v61 = vpop.eup %4175 }
 0xca7   :  { %v4667_v62 = vmul.f32 %v4176_v61, %v4172_v41 }
 0xca9   :  { %3989 = vmatmul.mubr.msk.f32.vlgmr.msra.gmra.mxu1 %vm1935_vm6, %v4667_v62 }
 0xcaa   :  { %3999 = vmatpush3.xpose.msk.msra.mxu1 %vm238_vm2, %v2217_v57  ;;  %4002 = vmatprep.mubr.msk.f32.mxu1 %vm4260_vm1, %v4259_v7 }
 0xcab   :  { %4000 = vmatprep.subr.mxu1 %v4259_v7 }
 0xcae   :  { %4001 = vmatpush3.xpose.msk.msra.mxu1 %vm238_vm2, %v2215_v63 }
 0xcaf   :  { %4012 = vmatprep.subr.mxu1 %v4259_v7 }
 0xcb1   :  { %4003 = vmatmul.mubr.msk.f32.vlgmr.msra.gmra.mxu1 %vm238_vm2, %v2213_v0 }
 0xcb2   :  { %4016 = vmatprep.mubr.msk.f32.mxu1 %vm4260_vm1, %v4259_v7 }
 0xd30   :  { %v2045_v1 = vpop.f32.mrf.mxu1 }
 0xd31   :  { %2128 = vst.msk [vmem:[#allocation2] sm:$0xff] %vm238_vm2, %v2045_v1 }
 0xd32   :  { %v3983_v2 = vpop.f32.mrf.mxu1 }
 0xd61   :  { %v2208_v3 = vpop.f32.mrf.mxu0 }
 0xd62   :  { %v2294_v4 = vmul.f32 0.35355338, %v2208_v3 }
 0xd63   :  { %v3997_v6 = vpop.f32.mrf.mxu0 }
 0xd64   :  { %v2296_v9 = vsel %vm1935_vm6, %v2294_v4, -inf }
 0xd65   :  { %2297 = vmax.xlane.f32.xlu0 %v2296_v9 }
 0xd69   :  { %v2124_v12 = vpop.f32.mrf.mxu1 }
 0xd6a   :  { %2129 = vst.msk [vmem:[#allocation2 + $0x8] sm:$0xff] %vm238_vm2, %v2124_v12 }
 0xd6b   :  { %v3990_v13 = vpop.f32.mrf.mxu1 }
 0xd71   :  { %v2290_v16 = vpop.f32.mrf.mxu1 }
 0xd72   :  { %v2295_v18 = vmul.f32 0.35355338, %v2290_v16 }
 0xd73   :  { %v4004_v59 = vpop.f32.mrf.mxu1 }
 0xd74   :  { %v2299_v20 = vsel %vm1935_vm6, %v2295_v18, -inf }
 0xd75   :  { %2300 = vmax.xlane.f32.xlu1 %v2299_v20 }
 0xd86   :  { %2331 = vrot.lane.b32.xlu1 %v4561_v10, %s4263_s15 }
 0xd8a   :  { %2329 = vrot.lane.b32.xlu1 %v4570_v45, %s4263_s15 }
 0xd8e   :  { %2408 = vrot.lane.b32.xlu1 %v4612_v19, %s4263_s15 }
 0xd92   :  { %2583 = vrot.lane.b32.xlu1 %v4604_v17, %s4267_s23 }
 0xd96   :  { %2581 = vrot.lane.b32.xlu1 %v4612_v19, %s4267_s23 }
 0xd9a   :  { %2579 = vrot.lane.b32.xlu1 %v4346_v15, %s4273_s30 }
 0xdee   :  { %v2298_v21 = vpop.xlane.xlu0 %2297 }
 0xdef   :  { %v2302_v22 = vsub.f32 %v2294_v4, %v2298_v21 }
 0xdf1   :  { %v2304_v23 = vmul.f32 1.442695, %v2302_v22 }
 0xdf3   :  { %4177 = vpow2.f32 %v2304_v23 }
 0xdfe   :  { %v2301_v26 = vpop.xlane.xlu1 %2300 }
 0xdff   :  { %v2303_v32 = vsub.f32 %v2295_v18, %v2301_v26 }
 0xe00   :  { %v4178_v27 = vpop.eup %4177 }
 0xe01   :  { %v2308_v28 = vsel %vm1935_vm6, %v4178_v27, 0.0  ;;  %v2306_v34 = vmul.f32 1.442695, %v2303_v32 }
 0xe02   :  { %v2332_v29 = vpop.permute.xlu1 %2331  ;;  %2309 = vadd.xlane.f32.xlu0 %v2308_v28 }
 0xe03   :  { %4006 = vmatpush3.msk.msra.mxu0 %vm1976_vm7, %v2332_v29  ;;  %4179 = vpow2.f32 %v2306_v34 }
 0xe04   :  { %4007 = vmatprep.subr.mxu0 %v4259_v7 }
 0xe06   :  { %v2330_v30 = vpop.permute.xlu1 %2329 }
 0xe07   :  { %4008 = vmatpush3.msra.mxu0 %v2330_v30 }
 0xe08   :  { %4019 = vmatprep.subr.mxu0 %v4259_v7 }
 0xe0a   :  { %v2409_v38 = vpop.permute.xlu1 %2408 }
 0xe0e   :  { %v2584_v47 = vpop.permute.xlu1 %2583 }
 0xe10   :  { %v4180_v35 = vpop.eup %4179 }
 0xe11   :  { %v2311_v37 = vsel %vm1935_vm6, %v4180_v35, 0.0 }
 0xe12   :  { %v2582_v55 = vpop.permute.xlu1 %2581 }
 0xe16   :  { %v2580_v56 = vpop.permute.xlu1 %2579 }
 0xe18   :  { %2410 = vrot.lane.b32.xlu0 %v4604_v17, %s4263_s15 }
 0xe1c   :  { %2501 = vrot.lane.b32.xlu0 %v4561_v10, %s4267_s23 }
 0xe3b   :  { %2312 = vadd.xlane.f32.xlu0 %v2311_v37 }
 0xe51   :  { %2499 = vrot.lane.b32.xlu0 %v4570_v45, %s4267_s23 }
 0xe55   :  { %2497 = vrot.lane.b32.xlu0 %v4342_v14, %s4273_s30 }
 0xe8b   :  { %v2310_v39 = vpop.xlane.xlu0 %2309 }
 0xe8c   :  { %4181 = vrcp.f32 %v2310_v39 }
 0xe8f   :  { %v2411_v36 = vpop.permute.xlu0 %2410 }
 0xe90   :  { %4013 = vmatpush3.msk.msra.mxu1 %vm1976_vm7, %v2411_v36 }
 0xe91   :  { %4014 = vmatprep.subr.mxu1 %v4259_v7 }
 0xe92   :  { %4015 = vmatpush3.msra.mxu1 %v2409_v38 }
 0xe93   :  { %4026 = vmatprep.subr.mxu1 %v4259_v7  ;;  %v2502_v42 = vpop.permute.xlu0 %2501 }
 0xe99   :  { %v4182_v40 = vpop.eup %4181 }
 0xe9a   :  { %v4712_v41 = vmul.f32 %v4182_v40, %v4178_v27 }
 0xe9c   :  { %4010 = vmatmul.mubr.msk.f32.vlgmr.msra.gmra.mxu0 %vm1935_vm6, %v4712_v41 }
 0xe9d   :  { %4020 = vmatpush3.xpose.msk.msra.mxu0 %vm238_vm2, %v2502_v42  ;;  %4023 = vmatprep.mubr.msk.f32.mxu0 %vm4260_vm1, %v4717_v43 }
 0xe9e   :  { %4021 = vmatprep.subr.mxu0 %v4717_v43 }
 0xec4   :  { %v2313_v44 = vpop.xlane.xlu0 %2312 }
 0xec5   :  { %4183 = vrcp.f32 %v2313_v44 }
 0xec8   :  { %v2500_v46 = vpop.permute.xlu0 %2499 }
 0xec9   :  { %4022 = vmatpush3.xpose.msk.msra.mxu0 %vm238_vm2, %v2500_v46 }
 0xeca   :  { %4033 = vmatprep.subr.mxu0 %v4717_v43 }
 0xecc   :  { %v2498_v7 = vpop.permute.xlu0 %2497 }
 0xecd   :  { %4024 = vmatmul.mubr.msk.f32.vlgmr.msra.gmra.mxu0 %vm238_vm2, %v2498_v7 }
 0xece   :  { %4037 = vmatprep.mubr.msk.f32.mxu0 %vm4260_vm1, %v4717_v43 }
 0xed2   :  { %v4184_v48 = vpop.eup %4183 }
 0xed3   :  { %v4727_v51 = vmul.f32 %v4184_v48, %v4180_v35 }
 0xed5   :  { %4017 = vmatmul.mubr.msk.f32.vlgmr.msra.gmra.mxu1 %vm1935_vm6, %v4727_v51 }
 0xed6   :  { %4027 = vmatpush3.xpose.msk.msra.mxu1 %vm238_vm2, %v2584_v47  ;;  %4030 = vmatprep.mubr.msk.f32.mxu1 %vm4260_vm1, %v4717_v43 }
 0xed7   :  { %4028 = vmatprep.subr.mxu1 %v4717_v43 }
 0xeda   :  { %4029 = vmatpush3.xpose.msk.msra.mxu1 %vm238_vm2, %v2582_v55 }
 0xedb   :  { %4040 = vmatprep.subr.mxu1 %v4717_v43 }
 0xedd   :  { %4031 = vmatmul.mubr.msk.f32.vlgmr.msra.gmra.mxu1 %vm238_vm2, %v2580_v56 }
 0xede   :  { %4044 = vmatprep.mubr.msk.f32.mxu1 %vm4260_vm1, %v4717_v43 }
 0xf5c   :  { %v4740_v60 = vpop.f32.mrf.mxu0 }
 0xf5e   :  { %v4011_v57 = vpop.f32.mrf.mxu0 }
 0xf8d   :  { %v2575_v61 = vpop.f32.mrf.mxu0 }
 0xf8e   :  { %v2661_v63 = vmul.f32 0.35355338, %v2575_v61 }
 0xf8f   :  { %v4025_v0 = vpop.f32.mrf.mxu0 }
 0xf90   :  { %v2663_v1 = vsel %vm1935_vm6, %v2661_v63, -inf }
 0xf91   :  { %2664 = vmax.xlane.f32.xlu0 %v2663_v1 }
 0xf95   :  { %v4743_v2 = vpop.f32.mrf.mxu1 }
 0xf97   :  { %v4018_v3 = vpop.f32.mrf.mxu1 }
 0xf9d   :  { %v2657_v4 = vpop.f32.mrf.mxu1 }
 0xf9e   :  { %v2662_v6 = vmul.f32 0.35355338, %v2657_v4 }
 0xf9f   :  { %v4032_v9 = vpop.f32.mrf.mxu1 }
 0xfa0   :  { %v2666_v12 = vsel %vm1935_vm6, %v2662_v6, -inf }
 0xfa1   :  { %2667 = vmax.xlane.f32.xlu1 %v2666_v12 }
 0xfb2   :  { %2698 = vrot.lane.b32.xlu1 %v4561_v10, %s4266_s22 }
 0xfb6   :  { %2696 = vrot.lane.b32.xlu1 %v4570_v45, %s4266_s22 }
 0xfba   :  { %2775 = vrot.lane.b32.xlu1 %v4612_v19, %s4266_s22 }
 0xfbe   :  { %2950 = vrot.lane.b32.xlu1 %v4604_v17, %s4270_s26 }
 0xfc2   :  { %2948 = vrot.lane.b32.xlu1 %v4612_v19, %s4270_s26 }
 0xfc6   :  { %2946 = vrot.lane.b32.xlu1 %v4346_v15, %s4272_s28 }
0x101a   :  { %v2665_v13 = vpop.xlane.xlu0 %2664 }
0x101b   :  { %v2669_v16 = vsub.f32 %v2661_v63, %v2665_v13 }
0x101d   :  { %v2671_v18 = vmul.f32 1.442695, %v2669_v16 }
0x101f   :  { %4185 = vpow2.f32 %v2671_v18 }
0x102a   :  { %v2668_v59 = vpop.xlane.xlu1 %2667 }
0x102b   :  { %v2670_v15 = vsub.f32 %v2662_v6, %v2668_v59 }
0x102c   :  { %v4186_v20 = vpop.eup %4185 }
0x102d   :  { %v2675_v21 = vsel %vm1935_vm6, %v4186_v20, 0.0  ;;  %v2673_v26 = vmul.f32 1.442695, %v2670_v15 }
0x102e   :  { %v2699_v22 = vpop.permute.xlu1 %2698  ;;  %2676 = vadd.xlane.f32.xlu0 %v2675_v21 }
0x102f   :  { %4034 = vmatpush3.msk.msra.mxu0 %vm1976_vm7, %v2699_v22  ;;  %4187 = vpow2.f32 %v2673_v26 }
0x1030   :  { %4035 = vmatprep.subr.mxu0 %v4717_v43 }
0x1032   :  { %v2697_v23 = vpop.permute.xlu1 %2696 }
0x1033   :  { %4036 = vmatpush3.msra.mxu0 %v2697_v23 }
0x1034   :  { %4047 = vmatprep.subr.mxu0 %v4717_v43 }
0x1036   :  { %v2776_v32 = vpop.permute.xlu1 %2775 }
0x103a   :  { %v2951_v38 = vpop.permute.xlu1 %2950 }
0x103c   :  { %v4188_v27 = vpop.eup %4187 }
0x103d   :  { %v2678_v28 = vsel %vm1935_vm6, %v4188_v27, 0.0 }
0x103e   :  { %v2949_v44 = vpop.permute.xlu1 %2948 }
0x1042   :  { %v2947_v46 = vpop.permute.xlu1 %2946 }
0x1044   :  { %2777 = vrot.lane.b32.xlu0 %v4604_v17, %s4266_s22 }
0x1048   :  { %2868 = vrot.lane.b32.xlu0 %v4561_v10, %s4270_s26 }
0x1067   :  { %2679 = vadd.xlane.f32.xlu0 %v2678_v28 }
0x107d   :  { %2866 = vrot.lane.b32.xlu0 %v4570_v45, %s4270_s26 }
0x1081   :  { %2864 = vrot.lane.b32.xlu0 %v4342_v14, %s4272_s28 }
0x10b7   :  { %v2677_v29 = vpop.xlane.xlu0 %2676 }
0x10b8   :  { %4189 = vrcp.f32 %v2677_v29 }
0x10bb   :  { %v2778_v30 = vpop.permute.xlu0 %2777 }
0x10bc   :  { %4041 = vmatpush3.msk.msra.mxu1 %vm1976_vm7, %v2778_v30 }
0x10bd   :  { %4042 = vmatprep.subr.mxu1 %v4717_v43 }
0x10be   :  { %4043 = vmatpush3.msra.mxu1 %v2776_v32 }
0x10bf   :  { %4054 = vmatprep.subr.mxu1 %v4717_v43  ;;  %v2869_v37 = vpop.permute.xlu0 %2868 }
0x10c5   :  { %v4190_v34 = vpop.eup %4189 }
0x10c6   :  { %v4774_v35 = vmul.f32 %v4190_v34, %v4186_v20 }
0x10c8   :  { %4038 = vmatmul.mubr.msk.f32.vlgmr.msra.gmra.mxu0 %vm1935_vm6, %v4774_v35 }
0x10c9   :  { %4048 = vmatpush3.xpose.msk.msra.mxu0 %vm238_vm2, %v2869_v37  ;;  %4051 = vmatprep.mubr.msk.f32.mxu0 %vm4260_vm1, %v4717_v43 }
0x10ca   :  { %4049 = vmatprep.subr.mxu0 %v4717_v43 }
0x10f0   :  { %v2680_v14 = vpop.xlane.xlu0 %2679 }
0x10f1   :  { %4191 = vrcp.f32 %v2680_v14  ;;  %v39_v14 = vld [vmem:[%s5006_s2 + $0x30] sm:$0xff] }
0x10f4   :  { %v2867_v39 = vpop.permute.xlu0 %2866 }
0x10f5   :  { %4050 = vmatpush3.xpose.msk.msra.mxu0 %vm238_vm2, %v2867_v39  ;;  %v38_v39 = vld [vmem:[%s5006_s2 + $0x28] sm:$0xff] }
0x10f6   :  { %4061 = vmatprep.subr.mxu0 %v4717_v43 }
0x10f8   :  { %v2865_v36 = vpop.permute.xlu0 %2864 }
0x10f9   :  { %4052 = vmatmul.mubr.msk.f32.vlgmr.msra.gmra.mxu0 %vm238_vm2, %v2865_v36  ;;  %v37_v36 = vld [vmem:[%s5006_s2 + $0x20] sm:$0xff] }
0x10fa   :  { %4065 = vmatprep.mubr.msk.f32.mxu0 %vm4260_vm1, %v4717_v43 }
0x10fe   :  { %v4192_v40 = vpop.eup %4191 }
0x10ff   :  { %v4787_v42 = vmul.f32 %v4192_v40, %v4188_v27 }
0x1101   :  { %4045 = vmatmul.mubr.msk.f32.vlgmr.msra.gmra.mxu1 %vm1935_vm6, %v4787_v42 }
0x1102   :  { %4055 = vmatpush3.xpose.msk.msra.mxu1 %vm238_vm2, %v2951_v38  ;;  %4058 = vmatprep.mubr.msk.f32.mxu1 %vm4260_vm1, %v4717_v43 }
0x1103   :  { %4056 = vmatprep.subr.mxu1 %v4717_v43 }
0x1106   :  { %4057 = vmatpush3.xpose.msk.msra.mxu1 %vm238_vm2, %v2949_v44 }
0x1107   :  { %4068 = vmatprep.subr.mxu1 %v4717_v43 }
0x1109   :  { %4059 = vmatmul.mubr.msk.f32.vlgmr.msra.gmra.mxu1 %vm238_vm2, %v2947_v46  ;;  %vm422_vm2 = vcmask 326912  }
0x110a   :  { %4072 = vmatprep.mubr.msk.f32.mxu1 %vm4260_vm1, %v4717_v43  ;;  %vm3492_vm1 = vcmask 523264  }
0x1188   :  { %v2771_v7 = vpop.f32.mrf.mxu0 }
0x118a   :  { %v4039_v47 = vpop.f32.mrf.mxu0 }
0x11b9   :  { %v2942_v48 = vpop.f32.mrf.mxu0 }
0x11ba   :  { %v3028_v55 = vmul.f32 0.35355338, %v2942_v48  ;;  %v4230_v48 = vld [vmem:[%s5004_s0 + $0x8] sm:$0xff] }
0x11bb   :  { %v4053_v56 = vpop.f32.mrf.mxu0 }
0x11bc   :  { %v3030_v57 = vsel %vm1935_vm6, %v3028_v55, -inf  ;;  %v4231_v56 = vld [vmem:[%s5004_s0] sm:$0xff] }
0x11bd   :  { %3031 = vmax.xlane.f32.xlu0 %v3030_v57 }
0x11c1   :  { %v2850_v61 = vpop.f32.mrf.mxu1 }
0x11c3   :  { %v4046_v63 = vpop.f32.mrf.mxu1 }
0x11c9   :  { %v3024_v0 = vpop.f32.mrf.mxu1 }
0x11ca   :  { %v3029_v1 = vmul.f32 0.35355338, %v3024_v0 }
0x11cb   :  { %v4060_v3 = vpop.f32.mrf.mxu1 }
0x11cc   :  { %v3033_v4 = vsel %vm1935_vm6, %v3029_v1, -inf }
0x11cd   :  { %3034 = vmax.xlane.f32.xlu1 %v3033_v4 }
0x11de   :  { %3065 = vrot.lane.b32.xlu1 %v4561_v10, %s4269_s25 }
0x11e2   :  { %3063 = vrot.lane.b32.xlu1 %v4570_v45, %s4269_s25 }
0x11e6   :  { %3142 = vrot.lane.b32.xlu1 %v4612_v19, %s4269_s25 }
0x11ea   :  { %2491 = vrot.lane.b32.xlu1 %v4743_v2, %s4272_s28 }
0x11ee   :  { %2858 = vrot.lane.b32.xlu1 %v2850_v61, %s4273_s30 }
0x1246   :  { %v3032_v6 = vpop.xlane.xlu0 %3031 }
0x1247   :  { %v3036_v9 = vsub.f32 %v3028_v55, %v3032_v6 }
0x1249   :  { %v3038_v12 = vmul.f32 1.442695, %v3036_v9 }
0x124b   :  { %4193 = vpow2.f32 %v3038_v12 }
0x1256   :  { %v3035_v13 = vpop.xlane.xlu1 %3034 }
0x1257   :  { %v3037_v16 = vsub.f32 %v3029_v1, %v3035_v13 }
0x1258   :  { %v4194_v18 = vpop.eup %4193 }
0x1259   :  { %v3040_v59 = vmul.f32 1.442695, %v3037_v16  ;;  %v3042_v10 = vsel %vm1935_vm6, %v4194_v18, 0.0 }
0x125a   :  { %v3066_v20 = vpop.permute.xlu1 %3065  ;;  %3043 = vadd.xlane.f32.xlu0 %v3042_v10  ;;  %v1765_v10 = vsub.s32 3, %v4329_v8 }
0x125b   :  { %4195 = vpow2.f32 %v3040_v59  ;;  %4062 = vmatpush3.msk.msra.mxu0 %vm1976_vm7, %v3066_v20  ;;  %v4872_v20 = vld [vmem:[%s5007_s3] sm:$0xff] }
0x125c   :  { %4063 = vmatprep.subr.mxu0 %v4717_v43 }
0x125e   :  { %v3064_v45 = vpop.permute.xlu1 %3063 }
0x125f   :  { %4064 = vmatpush3.msra.mxu0 %v3064_v45  ;;  %v4875_v45 = vrot.slane %v4872_v20, %v1765_v10  ;;  %v4233_v10 = vld [vmem:[%s5005_s1 + $0x28] sm:$0xff] }
0x1262   :  { %v3143_v19 = vpop.permute.xlu1 %3142 }
0x1266   :  { %v2492_v2 = vpop.permute.xlu1 %2491 }
0x1267   :  { %2496 = vst.msk [vmem:[#allocation2 + $0x8] sm:$0xff] %vm926_vm3, %v2492_v2 }
0x1268   :  { %v4196_v21 = vpop.eup %4195 }
0x1269   :  { %v3045_v22 = vsel %vm1935_vm6, %v4196_v21, 0.0 }
0x126a   :  { %3046 = vadd.xlane.f32.xlu0 %v3045_v22  ;;  %v2859_v23 = vpop.permute.xlu1 %2858 }
0x126b   :  { %2863 = vst.msk [vmem:[#allocation2 + $0x8] sm:$0xff] %vm1278_vm4, %v2859_v23 }
0x1280   :  { %3144 = vrot.lane.b32.xlu0 %v4604_v17, %s4269_s25 }
0x1284   :  { %2489 = vrot.lane.b32.xlu0 %v4740_v60, %s4272_s28 }
0x1288   :  { %2856 = vrot.lane.b32.xlu0 %v2771_v7, %s4273_s30 }
0x12e3   :  { %v3044_v15 = vpop.xlane.xlu0 %3043 }
0x12e4   :  { %4197 = vrcp.f32 %v3044_v15 }
0x12f1   :  { %v4198_v26 = vpop.eup %4197 }
0x12f2   :  { %v4822_v27 = vmul.f32 %v4198_v26, %v4194_v18 }
0x12f3   :  { %v3047_v28 = vpop.xlane.xlu0 %3046 }
0x12f4   :  { %4199 = vrcp.f32 %v3047_v28  ;;  %4066 = vmatmul.mubr.msk.f32.vlgmr.msra.gmra.mxu0 %vm1935_vm6, %v4822_v27 }
0x12f7   :  { %v3145_v29 = vpop.permute.xlu0 %3144 }
0x12f8   :  { %4069 = vmatpush3.msk.msra.mxu1 %vm1976_vm7, %v3145_v29  ;;  %vm2326_vm7 = vcmask 720480  }
0x12f9   :  { %4070 = vmatprep.subr.mxu1 %v4717_v43  ;;  %v40_v43 = vld [vmem:[%s5006_s2 + $0x38] sm:$0xff] }
0x12fa   :  { %4071 = vmatpush3.msra.mxu1 %v3143_v19  ;;  %4075 = vmatprep.subr.mxu0 %v40_v43 }
0x12fb   :  { %v2490_v17 = vpop.permute.xlu0 %2489  ;;  %4076 = vmatpush3.msra.mxu0 %v40_v43 }
0x12fc   :  { %2495 = vst.msk [vmem:[#allocation2] sm:$0xff] %vm926_vm3, %v2490_v17  ;;  %4077 = vmatprep.subr.mxu0 %v39_v14  ;;  %vm765_vm3 = vcmask 392512  }
0x12fd   :  { %4078 = vmatpush3.msra.mxu0 %v39_v14 }
0x12fe   :  { %4079 = vmatprep.subr.mxu0 %v38_v39 }
0x12ff   :  { %v2857_v60 = vpop.permute.xlu0 %2856  ;;  %4080 = vmatpush3.msra.mxu0 %v38_v39 }
0x1300   :  { %2862 = vst.msk [vmem:[#allocation2] sm:$0xff] %vm1278_vm4, %v2857_v60  ;;  %4081 = vmatprep.subr.mxu0 %v37_v36  ;;  %vm1117_vm4 = vcmask 458112  }
0x1301   :  { %v4200_v30 = vpop.eup %4199  ;;  %4082 = vmatpush3.msra.mxu0 %v37_v36 }
0x1302   :  { %v4830_v32 = vmul.f32 %v4200_v30, %v4196_v21 }
0x1304   :  { %4073 = vmatmul.mubr.msk.f32.vlgmr.msra.gmra.mxu1 %vm1935_vm6, %v4830_v32  ;;  %vm1966_vm6 = vcmask 622080  }
0x13b4   :  { %v3138_v34 = vpop.f32.mrf.mxu0 }
0x13b5   :  { %3223 = vrot.lane.b32.xlu0 %v3138_v34, %s4274_s14 }
0x13b6   :  { %v4067_v37 = vpop.f32.mrf.mxu0 }
0x13b9   :  { %1636 = vrot.lane.b32.xlu0 %v4548_v49, %s4262_s12 }
0x13c4   :  { %v3217_v38 = vpop.f32.mrf.mxu1 }
0x13c5   :  { %3225 = vrot.lane.b32.xlu1 %v3217_v38, %s4274_s14 }
0x13c6   :  { %v4074_v40 = vpop.f32.mrf.mxu1 }
0x1427   :  { %v3224_v44 = vpop.permute.xlu0 %3223 }
0x1428   :  { %3229 = vst.msk [vmem:[#allocation2] sm:$0xff] %vm1630_vm5, %v3224_v44 }
0x142b   :  { %v1637_v46 = vpop.permute.xlu0 %1636 }
0x142c   :  { %v1712_v7 = vadd.f32 %v4623_v25, %v1637_v46  ;;  %v1717_v47 = vadd.f32 %v4621_v24, %v1637_v46 }
0x142e   :  { %v1721_v55 = vadd.f32 %v4230_v48, %v1717_v47  ;;  %v1720_v57 = vadd.f32 %v4231_v56, %v1712_v7 }
0x142f   :  { %v3231_v61 = vld [vmem:[#allocation2] sm:$0xff] }
0x1430   :  { %4083 = vmatprep.mubr.msk.f32.mxu0 %vm54_vm0, %v3231_v61  ;;  %v1725_v63 = vsel %vm54_vm0, %v1721_v55, 0.0  ;;  %v1722_v0 = vsel %vm54_vm0, %v1720_v57, 0.0 }
0x1431   :  { %1726 = vadd.xlane.f32.xlu0 %v1725_v63  ;;  %1723 = vadd.xlane.f32.xlu1 %v1722_v0 }
0x1437   :  { %v3226_v24 = vpop.permute.xlu1 %3225 }
0x1438   :  { %3230 = vst.msk [vmem:[#allocation2 + $0x8] sm:$0xff] %vm1630_vm5, %v3226_v24  ;;  %vm1469_vm5 = vcmask 523712  }
0x143f   :  { %v3232_v25 = vld [vmem:[#allocation2 + $0x8] sm:$0xff] }
0x1440   :  { %4084 = vmatmul.mubr.msk.f32.vlgmr.msra.gmra.mxu0 %vm54_vm0, %v3232_v25 }
0x14ba   :  { %v1727_v1 = vpop.xlane.xlu0 %1726  ;;  %v1724_v3 = vpop.xlane.xlu1 %1723 }
0x14bb   :  { %v1730_v4 = vmul.f32 0.03125, %v1727_v1  ;;  %v1729_v6 = vmul.f32 0.03125, %v1724_v3 }
0x14bd   :  { %v1732_v9 = vsub.f32 %v1721_v55, %v1730_v4  ;;  %v1731_v12 = vsub.f32 %v1720_v57, %v1729_v6 }
0x14bf   :  { %v1734_v13 = vmul.f32 %v1732_v9, %v1732_v9  ;;  %v1733_v16 = vmul.f32 %v1731_v12, %v1731_v12 }
0x14c1   :  { %v1738_v18 = vsel %vm54_vm0, %v1734_v13, 0.0  ;;  %v1735_v59 = vsel %vm54_vm0, %v1733_v16, 0.0 }
0x14c2   :  { %1739 = vadd.xlane.f32.xlu1 %v1738_v18  ;;  %1736 = vadd.xlane.f32.xlu0 %v1735_v59 }
0x14d3   :  { %3233 = vrot.lane.b32.xlu1 %v4548_v49, %s4275_s17 }
0x14d8   :  { %1770 = vrot.lane.b32.xlu0 %v4875_v45, %s4261_s29 }
0x1500   :  { %v4085_v39 = vpop.f32.mrf.mxu0 }
0x1502   :  { %v3308_v47 = vpop.f32.mrf.mxu0 }
0x154b   :  { %v1737_v19 = vpop.xlane.xlu0 %1736  ;;  %v1740_v2 = vpop.xlane.xlu1 %1739 }
0x154c   :  { %v1741_v21 = vmul.f32 0.03125, %v1737_v19  ;;  %v1742_v22 = vmul.f32 0.03125, %v1740_v2  ;;  %v4234_v19 = vld [vmem:[%s5005_s1 + $0x38] sm:$0xff] }
0x154d   :  { %v4235_v2 = vld [vmem:[%s5005_s1 + $0x18] sm:$0xff] }
0x154e   :  { %v1743_v23 = vadd.f32 1e-12, %v1741_v21  ;;  %v1744_v15 = vadd.f32 1e-12, %v1742_v22  ;;  %v4236_v21 = vld [vmem:[%s5005_s1 + $0x8] sm:$0xff]  ;;  %v3371_v22 = vsub.s32 2, %v4329_v8 }
0x154f   :  { %v3234_v40 = vpop.permute.xlu1 %3233  ;;  %v1771_v44 = vpop.permute.xlu0 %1770 }
0x1550   :  { %4201 = vrsqrt.f32 %v1743_v23  ;;  %vm1747_vm8 = vcmp.eq.f32.partialorder %v1743_v23, inf  ;;  %v1750_v29 = vand.u32 2147483648, %v1743_v23  ;;  %vm1749_vm9 = vcmp.eq.f32.partialorder %v1743_v23, 0.0 }
0x1551   :  { %4203 = vrsqrt.f32 %v1744_v15  ;;  %vm1754_vm10 = vcmp.eq.f32.partialorder %v1744_v15, inf  ;;  %v1757_v30 = vand.u32 2147483648, %v1744_v15  ;;  %vm1756_vm11 = vcmp.eq.f32.partialorder %v1744_v15, 0.0 }
0x1552   :  { %v3309_v55 = vadd.f32 %v3308_v47, %v3234_v40  ;;  %v3314_v57 = vadd.f32 %v4085_v39, %v3234_v40 }
0x155d   :  { %v4202_v49 = vpop.eup %4201 }
0x155e   :  { %v4204_v26 = vpop.eup %4203  ;;  %v1746_v28 = vmul.f32 %v4202_v49, %v1743_v23 }
0x155f   :  { %v1753_v17 = vmul.f32 %v4204_v26, %v1744_v15 }
0x1560   :  { %v1748_v60 = vsel %vm1747_vm8, %v1743_v23, %v1746_v28  ;;  %v4907_v23 = vrot.slane %v4872_v20, %v3371_v22  ;;  %vm2693_vm8 = vcmask 818880  }
0x1561   :  { %v1755_v34 = vsel %vm1754_vm10, %v1744_v15, %v1753_v17  ;;  %v1751_v37 = vsel %vm1749_vm9, %v1750_v29, %v1748_v60 }
0x1562   :  { %4205 = vrcp.f32 %v1751_v37  ;;  %v1758_v43 = vsel %vm1756_vm11, %v1757_v30, %v1755_v34  ;;  %vm3060_vm11 = vcmask 917280  }
0x1563   :  { %4207 = vrcp.f32 %v1758_v43 }
0x156f   :  { %v4206_v14 = vpop.eup %4205 }
0x1570   :  { %v4208_v36 = vpop.eup %4207  ;;  %v1760_v38 = vmul.f32 %v4206_v14, %v1731_v12 }
0x1571   :  { %v1762_v46 = vmul.f32 %v4208_v36, %v1732_v9 }
0x1572   :  { %v1767_v7 = vmul.f32 %v4875_v45, %v1760_v38 }
0x1573   :  { %v1768_v48 = vmul.f32 %v4875_v45, %v1762_v46 }
0x1574   :  { %v1773_v56 = vadd.f32 %v1771_v44, %v1767_v7 }
0x1575   :  { %v1774_v61 = vadd.f32 %v1771_v44, %v1768_v48 }
0x1576   :  { %v3317_v63 = vadd.f32 %v3309_v55, %v1773_v56 }
0x1577   :  { %v3318_v0 = vadd.f32 %v3314_v57, %v1774_v61 }
0x1578   :  { %v3319_v24 = vsel %vm54_vm0, %v3317_v63, 0.0 }
0x1579   :  { %v3322_v25 = vsel %vm54_vm0, %v3318_v0, 0.0  ;;  %3320 = vadd.xlane.f32.xlu1 %v3319_v24 }
0x157a   :  { %3323 = vadd.xlane.f32.xlu0 %v3322_v25 }
0x1602   :  { %v3321_v1 = vpop.xlane.xlu1 %3320 }
0x1603   :  { %v3324_v3 = vpop.xlane.xlu0 %3323  ;;  %v3325_v4 = vmul.f32 0.03125, %v3321_v1  ;;  %v48_v1 = vld [vmem:[%s5006_s2 + $0x78] sm:$0xff] }
0x1604   :  { %v3326_v6 = vmul.f32 0.03125, %v3324_v3  ;;  %v47_v3 = vld [vmem:[%s5006_s2 + $0x70] sm:$0xff]  ;;  %4097 = vmatprep.subr.mxu0 %v48_v1 }
0x1605   :  { %v3327_v9 = vsub.f32 %v3317_v63, %v3325_v4  ;;  %4098 = vmatpush3.msra.mxu0 %v48_v1  ;;  %v46_v4 = vld [vmem:[%s5006_s2 + $0x68] sm:$0xff] }
0x1606   :  { %v3328_v12 = vsub.f32 %v3318_v0, %v3326_v6  ;;  %4099 = vmatprep.subr.mxu0 %v47_v3  ;;  %v45_v6 = vld [vmem:[%s5006_s2 + $0x60] sm:$0xff] }
0x1607   :  { %v3329_v13 = vmul.f32 %v3327_v9, %v3327_v9  ;;  %4100 = vmatpush3.msra.mxu0 %v47_v3 }
0x1608   :  { %v3330_v16 = vmul.f32 %v3328_v12, %v3328_v12  ;;  %4101 = vmatprep.subr.mxu0 %v46_v4 }
0x1609   :  { %v3331_v18 = vsel %vm54_vm0, %v3329_v13, 0.0  ;;  %4102 = vmatpush3.msra.mxu0 %v46_v4  ;;  %v42_v13 = vld [vmem:[%s5006_s2 + $0x48] sm:$0xff]  ;;  %v3618_v4 = vsub.s32 4, %v4329_v8 }
0x160a   :  { %v3334_v59 = vsel %vm54_vm0, %v3330_v16, 0.0  ;;  %3332 = vadd.xlane.f32.xlu0 %v3331_v18  ;;  %4103 = vmatprep.subr.mxu0 %v45_v6  ;;  %v41_v16 = vld [vmem:[%s5006_s2 + $0x40] sm:$0xff] }
0x160b   :  { %3335 = vadd.xlane.f32.xlu1 %v3334_v59  ;;  %4104 = vmatpush3.msra.mxu0 %v45_v6  ;;  %v3619_v6 = vrot.slane %v4872_v20, %v3618_v4 }
0x161c   :  { %3381 = vrot.lane.b32.xlu1 %v4233_v10, %s4262_s12 }
0x1620   :  { %3383 = vrot.lane.b32.xlu0 %v4234_v19, %s4262_s12  ;;  %3359 = vrot.lane.b32.xlu1 %v4875_v45, %s4262_s12 }
0x1624   :  { %3379 = vrot.lane.b32.xlu0 %v4235_v2, %s4262_s12  ;;  %3364 = vrot.lane.b32.xlu1 %v4875_v45, %s4275_s17 }
0x1628   :  { %3377 = vrot.lane.b32.xlu0 %v4236_v21, %s4262_s12  ;;  %3489 = vrot.lane.b32.xlu1 %v4907_v23, %s4262_s12 }
0x1693   :  { %v3333_v15 = vpop.xlane.xlu0 %3332 }
0x1694   :  { %v3337_v49 = vmul.f32 0.03125, %v3333_v15  ;;  %v3336_v26 = vpop.xlane.xlu1 %3335 }
0x1695   :  { %v3338_v28 = vmul.f32 0.03125, %v3336_v26 }
0x1696   :  { %v3339_v29 = vadd.f32 1e-12, %v3337_v49 }
0x1697   :  { %v3340_v45 = vadd.f32 1e-12, %v3338_v28  ;;  %v3384_v17 = vpop.permute.xlu0 %3383 }
0x1698   :  { %4209 = vrsqrt.f32 %v3339_v29  ;;  %4086 = vmatprep.subr.mxu1 %v3384_v17  ;;  %v3382_v60 = vpop.permute.xlu1 %3381  ;;  %vm3343_vm12 = vcmp.eq.f32.partialorder %v3339_v29, inf  ;;  %v3346_v39 = vand.u32 2147483648, %v3339_v29  ;;  %vm3345_vm13 = vcmp.eq.f32.partialorder %v3339_v29, 0.0 }
0x1699   :  { %4211 = vrsqrt.f32 %v3340_v45  ;;  %4087 = vmatpush3.msra.mxu1 %v3384_v17  ;;  %vm3350_vm14 = vcmp.eq.f32.partialorder %v3340_v45, inf  ;;  %v3353_v40 = vand.u32 2147483648, %v3340_v45  ;;  %vm3352_vm15 = vcmp.eq.f32.partialorder %v3340_v45, 0.0 }
0x169a   :  { %4088 = vmatprep.subr.mxu1 %v3382_v60 }
0x169b   :  { %4089 = vmatpush3.msra.mxu1 %v3382_v60  ;;  %v3380_v30 = vpop.permute.xlu0 %3379 }
0x169c   :  { %4090 = vmatprep.subr.mxu1 %v3380_v30  ;;  %v3360_v47 = vpop.permute.xlu1 %3359 }
0x169d   :  { %4091 = vmatpush3.msra.mxu1 %v3380_v30 }
0x169f   :  { %v3378_v34 = vpop.permute.xlu0 %3377 }
0x16a0   :  { %4092 = vmatprep.subr.mxu1 %v3378_v34  ;;  %v3365_v61 = vpop.permute.xlu1 %3364 }
0x16a1   :  { %4093 = vmatpush3.msra.mxu1 %v3378_v34 }
0x16a5   :  { %v4210_v37 = vpop.eup %4209 }
0x16a6   :  { %v4212_v43 = vpop.eup %4211  ;;  %v3342_v14 = vmul.f32 %v4210_v37, %v3339_v29 }
0x16a7   :  { %v3349_v36 = vmul.f32 %v4212_v43, %v3340_v45 }
0x16a8   :  { %v3344_v38 = vsel %vm3343_vm12, %v3339_v29, %v3342_v14 }
0x16a9   :  { %v3351_v44 = vsel %vm3350_vm14, %v3340_v45, %v3349_v36  ;;  %v3347_v46 = vsel %vm3345_vm13, %v3346_v39, %v3344_v38  ;;  %v3490_v36 = vpop.permute.xlu1 %3489 }
0x16aa   :  { %v3354_v7 = vsel %vm3352_vm15, %v3353_v40, %v3351_v44  ;;  %4213 = vrcp.f32 %v3347_v46 }
0x16ab   :  { %4215 = vrcp.f32 %v3354_v7 }
0x16b7   :  { %v4214_v48 = vpop.eup %4213 }
0x16b8   :  { %v4216_v55 = vpop.eup %4215  ;;  %v3356_v56 = vmul.f32 %v4214_v48, %v3327_v9  ;;  %v44_v9 = vld [vmem:[%s5006_s2 + $0x58] sm:$0xff] }
0x16b9   :  { %v3358_v57 = vmul.f32 %v4216_v55, %v3328_v12  ;;  %v43_v12 = vld [vmem:[%s5006_s2 + $0x50] sm:$0xff]  ;;  %4105 = vmatprep.subr.mxu0 %v44_v9  ;;  %s4276_s2 = smov 76  }
0x16ba   :  { %v3362_v63 = vmul.f32 %v3360_v47, %v3356_v56  ;;  %4106 = vmatpush3.msra.mxu0 %v44_v9 }
0x16bb   :  { %v3363_v0 = vmul.f32 %v3360_v47, %v3358_v57  ;;  %4107 = vmatprep.subr.mxu0 %v43_v12 }
0x16bc   :  { %v3367_v24 = vadd.f32 %v3365_v61, %v3362_v63  ;;  %4108 = vmatpush3.msra.mxu0 %v43_v12 }
0x16bd   :  { %v3368_v25 = vadd.f32 %v3365_v61, %v3363_v0  ;;  %4109 = vmatprep.subr.mxu0 %v42_v13 }
0x16be   :  { %4094 = vmatprep.mubr.msk.f32.mxu1 %vm54_vm0, %v3367_v24  ;;  %4110 = vmatpush3.msra.mxu0 %v42_v13 }
0x16bf   :  { %4095 = vmatmul.mubr.msk.f32.vlgmr.msra.gmra.mxu1 %vm54_vm0, %v3368_v25  ;;  %4111 = vmatprep.subr.mxu0 %v41_v16 }
0x16c0   :  { %4112 = vmatpush3.msra.mxu0 %v41_v16 }
0x177f   :  { %v4096_v18 = vpop.f32.mrf.mxu1 }
0x1780   :  { %v3467_v59 = vadd.f32 %v4096_v18, %v4907_v23 }
0x1781   :  { %v3461_v10 = vpop.f32.mrf.mxu1 }
0x1782   :  { %v3473_v19 = vmul.f32 0.044715, %v3467_v59  ;;  %v3462_v2 = vadd.f32 %v3461_v10, %v4907_v23  ;;  %v3471_v14 = vmul.f32 0.5, %v3467_v59 }
0x1784   :  { %v3475_v21 = vmul.f32 %v3473_v19, %v3467_v59  ;;  %v3472_v22 = vmul.f32 0.044715, %v3462_v2  ;;  %v3470_v37 = vmul.f32 0.5, %v3462_v2 }
0x1786   :  { %v3477_v15 = vmul.f32 %v3475_v21, %v3467_v59  ;;  %v3474_v49 = vmul.f32 %v3472_v22, %v3462_v2 }
0x1788   :  { %v3479_v26 = vadd.f32 %v3477_v15, %v3467_v59  ;;  %v3476_v28 = vmul.f32 %v3474_v49, %v3462_v2 }
0x178a   :  { %v3481_v29 = vmul.f32 0.7978846, %v3479_v26  ;;  %v3478_v45 = vadd.f32 %v3476_v28, %v3462_v2 }
0x178c   :  { %4217 = vtanh.f32 %v3481_v29  ;;  %v3480_v17 = vmul.f32 0.7978846, %v3478_v45 }
0x178e   :  { %4219 = vtanh.f32 %v3480_v17 }
0x1799   :  { %v4218_v60 = vpop.eup %4217 }
0x179a   :  { %v3485_v34 = vadd.f32 1.0, %v4218_v60 }
0x179b   :  { %v4220_v30 = vpop.eup %4219 }
0x179c   :  { %v3484_v43 = vadd.f32 1.0, %v4220_v30  ;;  %v3487_v23 = vmul.f32 %v3485_v34, %v3471_v14 }
0x179e   :  { %v3486_v39 = vmul.f32 %v3484_v43, %v3470_v37 }
0x17a0   :  { %4113 = vmatprep.mubr.msk.f32.mxu0 %vm3492_vm1, %v3486_v39 }
0x17a1   :  { %4114 = vmatmul.mubr.msk.f32.vlgmr.msra.gmra.mxu0 %vm3492_vm1, %v3487_v23 }
0x1861   :  { %v4115_v38 = vpop.f32.mrf.mxu0 }
0x1862   :  { %v3571_v40 = vadd.f32 %v4115_v38, %v3490_v36 }
0x1863   :  { %v3565_v44 = vpop.f32.mrf.mxu0 }
0x1864   :  { %v3575_v46 = vadd.f32 %v3571_v40, %v3368_v25  ;;  %v3566_v7 = vadd.f32 %v3565_v44, %v3490_v36 }
0x1866   :  { %v3574_v47 = vadd.f32 %v3566_v7, %v3367_v24  ;;  %v3579_v48 = vsel %vm54_vm0, %v3575_v46, 0.0 }
0x1867   :  { %3580 = vadd.xlane.f32.xlu1 %v3579_v48 }
0x1868   :  { %v3576_v55 = vsel %vm54_vm0, %v3574_v47, 0.0 }
0x1869   :  { %3577 = vadd.xlane.f32.xlu0 %v3576_v55 }
0x1878   :  { %416 = vrot.lane.b32.xlu1 %v4416_v52, %s4275_s17 }
0x187c   :  { %759 = vrot.lane.b32.xlu1 %v4462_v31, %s4271_s27 }
0x187f   :  { %418 = vrot.lane.b32.xlu0 %v4423_v54, %s4275_s17  ;;  %s4277_s17 = smov 100  }
0x1880   :  { %761 = vrot.lane.b32.xlu1 %v4469_v33, %s4271_s27 }
0x1884   :  { %1113 = vrot.lane.b32.xlu1 %v4513_v11, %s4268_s24 }
0x1888   :  { %1465 = vrot.lane.b32.xlu1 %v4557_v58, %s4265_s21 }
0x188c   :  { %1962 = vrot.lane.b32.xlu1 %v4667_v62, %s4262_s12 }
0x1890   :  { %2322 = vrot.lane.b32.xlu1 %v4727_v51, %s4276_s2 }
0x1894   :  { %2689 = vrot.lane.b32.xlu1 %v4787_v42, %s4263_s15 }
0x1898   :  { %3054 = vrot.lane.b32.xlu1 %v4822_v27, %s4277_s17 }
0x18f0   :  { %v3581_v52 = vpop.xlane.xlu1 %3580 }
0x18f1   :  { %v3583_v54 = vmul.f32 0.03125, %v3581_v52 }
0x18f2   :  { %v3578_v31 = vpop.xlane.xlu0 %3577 }
0x18f3   :  { %v4961_v33 = vsub.f32 %v3575_v46, %v3583_v54  ;;  %v3582_v11 = vmul.f32 0.03125, %v3578_v31 }
0x18f4   :  { %v417_v58 = vpop.permute.xlu1 %416 }
0x18f5   :  { %v4963_v62 = vsub.f32 %v3574_v47, %v3582_v11  ;;  %423 = vst.msk [vmem:[#allocation3] sm:$0xff] %vm422_vm2, %v417_v58  ;;  %v3587_v51 = vmul.f32 %v4961_v33, %v4961_v33 }
0x18f6   :  { %v419_v56 = vpop.permute.xlu0 %418 }
0x18f7   :  { %424 = vst.msk [vmem:[#allocation3 + $0x8] sm:$0xff] %vm422_vm2, %v419_v56  ;;  %v3591_v42 = vsel %vm54_vm0, %v3587_v51, 0.0  ;;  %v3586_v27 = vmul.f32 %v4963_v62, %v4963_v62 }
0x18f8   :  { %v760_v57 = vpop.permute.xlu1 %759  ;;  %3592 = vadd.xlane.f32.xlu0 %v3591_v42 }
0x18f9   :  { %766 = vst.msk [vmem:[#allocation3] sm:$0xff] %vm765_vm3, %v760_v57  ;;  %v3588_v61 = vsel %vm54_vm0, %v3586_v27, 0.0 }
0x18fc   :  { %v762_v63 = vpop.permute.xlu1 %761  ;;  %3589 = vadd.xlane.f32.xlu0 %v3588_v61 }
0x18fd   :  { %767 = vst.msk [vmem:[#allocation3 + $0x8] sm:$0xff] %vm765_vm3, %v762_v63 }
0x1900   :  { %v1114_v0 = vpop.permute.xlu1 %1113 }
0x1901   :  { %1119 = vst.msk [vmem:[#allocation3 + $0x8] sm:$0xff] %vm1117_vm4, %v1114_v0 }
0x1904   :  { %v1466_v24 = vpop.permute.xlu1 %1465 }
0x1905   :  { %1471 = vst.msk [vmem:[#allocation3 + $0x8] sm:$0xff] %vm1469_vm5, %v1466_v24 }
0x1908   :  { %v1963_v25 = vpop.permute.xlu1 %1962 }
0x1909   :  { %1968 = vst.msk [vmem:[#allocation3 + $0x8] sm:$0xff] %vm1966_vm6, %v1963_v25 }
0x190c   :  { %v2323_v1 = vpop.permute.xlu1 %2322 }
0x190d   :  { %2328 = vst.msk [vmem:[#allocation3 + $0x8] sm:$0xff] %vm2326_vm7, %v2323_v1 }
0x1910   :  { %v2690_v3 = vpop.permute.xlu1 %2689 }
0x1911   :  { %2695 = vst.msk [vmem:[#allocation3 + $0x8] sm:$0xff] %vm2693_vm8, %v2690_v3 }
0x1912   :  { %1111 = vrot.lane.b32.xlu0 %v4506_v5, %s4268_s24 }
0x1914   :  { %v3055_v22 = vpop.permute.xlu1 %3054 }
0x1916   :  { %1463 = vrot.lane.b32.xlu0 %v4551_v53, %s4265_s21 }
0x191a   :  { %1960 = vrot.lane.b32.xlu0 %v4653_v50, %s4262_s12 }
0x191e   :  { %2320 = vrot.lane.b32.xlu0 %v4712_v41, %s4276_s2 }
0x1922   :  { %2687 = vrot.lane.b32.xlu0 %v4774_v35, %s4263_s15 }
0x1926   :  { %3623 = vrot.lane.b32.xlu0 %v3619_v6, %s4261_s29  ;;  %s4278_s29 = smov [#allocation3]  }
0x1927   :  { %s3635_s12 = sshll.u32 %s4278_s29, 4  ;;  %s3636_s12 = int_to_ptr.vmem [resolvable:$true] %s3635_s12 }
0x1928   :  { %s4237_s15 = scalar_lea.vmem %s3636_s12, 256  ;;  %p4242_p1 = scmp.lt.s32.totalorder %s3636_s12, %s3636_s12 }
0x1929   :  { %p4238_p0 = scmp.ne.s32.totalorder %s3636_s12, %s4237_s15  ;;  %p4243_p2 = scmp.lt.s32.totalorder %s4237_s15, %s4237_s15 }
0x192a   :  { %3056 = vrot.lane.b32.xlu0 %v4830_v32, %s4277_s17 }
0x192b   :  { %p4244_p3 = por %p4243_p2, %p4242_p1 }
0x192d   :  { %p4245_p4 = pnand %p4244_p3, %p4238_p0 }
0x1981   :  { %v3593_v5 = vpop.xlane.xlu0 %3592 }
0x1982   :  { %v3595_v53 = vmul.f32 0.03125, %v3593_v5 }
0x1984   :  { %v3597_v9 = vadd.f32 1e-12, %v3595_v53 }
0x1985   :  { %v3590_v12 = vpop.xlane.xlu0 %3589 }
0x1986   :  { %4221 = vrsqrt.f32 %v3597_v9  ;;  %v3594_v50 = vmul.f32 0.03125, %v3590_v12  ;;  %vm3607_vm9 = vcmp.eq.f32.partialorder %v3597_v9, inf  ;;  %v3610_v32 = vand.u32 2147483648, %v3597_v9 }
0x1987   :  { %vm3609_vm10 = vcmp.eq.f32.partialorder %v3597_v9, 0.0 }
0x1988   :  { %v3596_v13 = vadd.f32 1e-12, %v3594_v50 }
0x1989   :  { %v1112_v41 = vpop.permute.xlu0 %1111 }
0x198a   :  { %1118 = vst.msk [vmem:[#allocation3] sm:$0xff] %vm1117_vm4, %v1112_v41  ;;  %4223 = vrsqrt.f32 %v3596_v13  ;;  %vm3600_vm12 = vcmp.eq.f32.partialorder %v3596_v13, inf  ;;  %v3603_v15 = vand.u32 2147483648, %v3596_v13  ;;  %vm3602_vm13 = vcmp.eq.f32.partialorder %v3596_v13, 0.0 }
0x198d   :  { %v1464_v8 = vpop.permute.xlu0 %1463 }
0x198e   :  { %1470 = vst.msk [vmem:[#allocation3] sm:$0xff] %vm1469_vm5, %v1464_v8 }
0x1991   :  { %v1961_v35 = vpop.permute.xlu0 %1960 }
0x1992   :  { %1967 = vst.msk [vmem:[#allocation3] sm:$0xff] %vm1966_vm6, %v1961_v35 }
0x1993   :  { %v4222_v20 = vpop.eup %4221 }
0x1994   :  { %v3606_v16 = vmul.f32 %v4222_v20, %v3597_v9 }
0x1995   :  { %v2321_v18 = vpop.permute.xlu0 %2320 }
0x1996   :  { %v3608_v59 = vsel %vm3607_vm9, %v3597_v9, %v3606_v16  ;;  %2327 = vst.msk [vmem:[#allocation3] sm:$0xff] %vm2326_vm7, %v2321_v18 }
0x1997   :  { %v3611_v10 = vsel %vm3609_vm10, %v3610_v32, %v3608_v59  ;;  %v4224_v19 = vpop.eup %4223 }
0x1998   :  { %4225 = vrcp.f32 %v3611_v10  ;;  %v3599_v2 = vmul.f32 %v4224_v19, %v3596_v13 }
0x1999   :  { %v2688_v21 = vpop.permute.xlu0 %2687 }
0x199a   :  { %2694 = vst.msk [vmem:[#allocation3] sm:$0xff] %vm2693_vm8, %v2688_v21  ;;  %v3601_v49 = vsel %vm3600_vm12, %v3596_v13, %v3599_v2 }
0x199b   :  { %3061 = vst.msk [vmem:[#allocation3] sm:$0xff] %vm3060_vm11, %v3055_v22  ;;  %v3604_v26 = vsel %vm3602_vm13, %v3603_v15, %v3601_v49 }
0x199c   :  { %4227 = vrcp.f32 %v3604_v26 }
0x199d   :  { %v3624_v28 = vpop.permute.xlu0 %3623 }
0x19a1   :  { %v3057_v29 = vpop.permute.xlu0 %3056 }
0x19a2   :  { %3062 = vst.msk [vmem:[#allocation3 + $0x8] sm:$0xff] %vm3060_vm11, %v3057_v29 }
0x19a5   :  { %v4226_v45 = vpop.eup %4225 }
0x19a6   :  { %v3615_v17 = vmul.f32 %v4226_v45, %v4961_v33 }
0x19a8   :  { %v3621_v60 = vmul.f32 %v3619_v6, %v3615_v17 }
0x19a9   :  { %v4228_v30 = vpop.eup %4227 }
0x19aa   :  { %v3627_v34 = vadd.f32 %v3624_v28, %v3621_v60  ;;  %v3613_v37 = vmul.f32 %v4228_v30, %v4963_v62 }
0x19ac   :  { %3629 = vst.msk [vmem:[#allocation3 + $0x8] sm:$0xff] %vm54_vm0, %v3627_v34  ;;  %v3620_v43 = vmul.f32 %v3619_v6, %v3613_v37 }
0x19ae   :  { %v3626_v14 = vadd.f32 %v3624_v28, %v3620_v43 }
0x19b0   :  { %3628 = vst.msk [vmem:[#allocation3] sm:$0xff] %vm54_vm0, %v3626_v14 }
0x19b1   :  { %4248 = shalt.err (!%p4245_p4)
}
0x19b2   :  { %s4279_s21 = smov 128  }
0x19b3   :  { %3641 = dma.vmem_to_hbm [thread:$0]  %s3636_s12, 256, %s5008_s4, [#allocation4], %s4279_s21, %s4279_s21, %s4272_s28  }
0x19b4   :  { %4257 = dma.done.wait [#allocation4], 256  }
0x19b5   :  { %4258 = vsyncadd [#allocation4], 4294967040 }
0x19b6   :  { %3645 = vsyncpa [#allocation4], 1 }

</bundles_post_ra>
